<compile_context>
chip_gen: v7x
topology: tpu7x:2x2x1
jax: 0.10.0
libtpu: 0.0.40
codegen_flags: <defaults>
</compile_context>

<pallas_src>
import functools

import jax
import jax.numpy as jnp
from jax.experimental import pallas as pl
from jax.experimental.pallas import tpu as pltpu

BN_EPS = 1e-5
LEAKY_SLOPE = 0.01          # F.leaky_relu default negative_slope
HID = 128                   # pointnet output width == encoder/decoder hidden
OUT_W = 2 * HID             # packed output: [mu|logvar|pad | recon|pad]


def _leaky_relu(x, slope=LEAKY_SLOPE):
    return jnp.where(x > 0, x, slope * x)


def _round8(x):
    return ((x + 7) // 8) * 8


def _slab128_layout(small_in):
    """Row offsets inside the 128-lane parameter slab (all blocks 8-aligned)."""
    off = {}
    # bias rows (one 16-row block, rows 0..8 used)
    off["b0"], off["eb1"], off["db1"], off["bmulv"] = 0, 1, 2, 3
    off["db2"], off["bfc"], off["eb2"], off["eb3"], off["bfeat"] = 4, 5, 6, 7, 8
    r = 16
    off["w0"] = r;     r += _round8(3)             # (3,128)  point MLP
    off["wfeat"] = r;  r += _round8(small_in)      # (small_in,128) block-diag mlps
    off["wfc"] = r;    r += HID                    # (128,128) fc_layer (lane-padded)
    off["ew2"] = r;    r += HID                    # (128,128) encoder mlp2
    off["ew3"] = r;    r += HID                    # (128,128) encoder mlp3 (K-pad)
    off["wmulv"] = r;  r += HID                    # (128,128) [get_mu|get_logvar]
    off["wzdec"] = r;  r += HID                    # (z,128)   decoder w1 z-rows
    off["dw2"] = r;    r += HID                    # (128,128) decoder mlp2
    off["rows"] = r
    return off


# ------------------------------ fused kernel ------------------------------- #

def fused_forward_kernel(pts_ref, small_ref, s128, s256, out_ref,
                         *, n_points, z_dim, small_in, off):
    f32, bf16 = jnp.float32, jnp.bfloat16
    Bp = small_ref.shape[0]

    # ---------------- PointNet2 surrogate ----------------
    # cp1 rows are appended at the end of pts -> one matmul covers points + cp1.
    w0 = s128[off["w0"]:off["w0"] + 3, :]
    b0 = s128[off["b0"]:off["b0"] + 1, :]
    h_all = jnp.maximum(
        jnp.dot(pts_ref[...].astype(bf16), w0.astype(bf16),
                preferred_element_type=f32) + b0, 0.0)            # (Bp*N+Bp, 128)
    h_cp = h_all[Bp * n_points:, :]                               # (Bp, 128) cp1 feat
    h_pts = h_all[:Bp * n_points, :].reshape(Bp, n_points, HID)
    # pcs[:, 0] = cp1 : drop original point 0 (0.0 mask is exact post-ReLU;
    # cp1's own feature is max-ed back in below).
    pid = jax.lax.broadcasted_iota(jnp.int32, (Bp, n_points, 1), 1)
    h_pts = jnp.where(pid == 0, 0.0, h_pts)
    g = jnp.maximum(jnp.max(h_pts, axis=1), h_cp)                 # global cloud feat
    l0 = h_cp + g                                                 # point-0 feature
    # exact fc_layer: Conv1d(128, feat, k=1, no bias) + folded eval-BN + ReLU
    net1 = jnp.maximum(
        jnp.dot(l0, s128[off["wfc"]:off["wfc"] + HID, :],
                preferred_element_type=f32)
        + s128[off["bfc"]:off["bfc"] + 1, :], 0.0)                # lanes>=feat are 0

    # ---------------- task / cp / dir feature MLPs (one block-diag matmul) --
    small = small_ref[...]
    feats_in = small[:, :small_in]                                # [task|cp1|dir1]
    noise = small[:, small_in:small_in + z_dim]
    feats = (jnp.dot(feats_in, s128[off["wfeat"]:off["wfeat"] + small_in, :],
                     preferred_element_type=f32)
             + s128[off["bfeat"]:off["bfeat"] + 1, :])            # [task_f|cp1_f|dir1_f|0]

    # ------- encoder layer 1 + decoder z-independent partial (one pass) -----
    ed = (jnp.dot(net1, s256[0:HID, :], preferred_element_type=f32)
          + jnp.dot(feats, s256[HID:2 * HID, :], preferred_element_type=f32))
    h1 = _leaky_relu(ed[:, :HID] + s128[off["eb1"]:off["eb1"] + 1, :])
    hd = ed[:, HID:] + s128[off["db1"]:off["db1"] + 1, :]

    # ---------------- rest of ActorEncoder ----------------
    h2 = _leaky_relu(
        jnp.dot(h1, s128[off["ew2"]:off["ew2"] + HID, :],
                preferred_element_type=f32)
        + s128[off["eb2"]:off["eb2"] + 1, :])
    h3 = (jnp.dot(h2, s128[off["ew3"]:off["ew3"] + HID, :],
                  preferred_element_type=f32)
          + s128[off["eb3"]:off["eb3"] + 1, :])
    mulv = (jnp.dot(h3, s128[off["wmulv"]:off["wmulv"] + HID, :],
                    preferred_element_type=f32)
            + s128[off["bmulv"]:off["bmulv"] + 1, :])             # [mu|logvar|0]
    mu = mulv[:, :z_dim]
    logvar = mulv[:, z_dim:2 * z_dim]
    z_all = mu + jnp.exp(0.5 * logvar) * noise                    # reparameterization

    # ---------------- rest of ActorDecoder ----------------
    hd = hd + jnp.dot(z_all, s128[off["wzdec"]:off["wzdec"] + z_dim, :],
                      preferred_element_type=f32)
    recon = (jnp.dot(hd, s128[off["dw2"]:off["dw2"] + HID, :],
                     preferred_element_type=f32)
             + s128[off["db2"]:off["db2"] + 1, :])                # [recon_dir1|0]

    # single packed lane-dense store
    out_ref[:, :HID] = mulv
    out_ref[:, HID:] = recon


# ------------------------------ wrapper ------------------------------------ #

def network_forward(params, pcs, task, cp1, dir1, noise):
    """Mirrors Network.forward(pcs, task, cp1, dir1) with one fused Pallas call."""
    B, N, _ = pcs.shape
    z_dim = noise.shape[1]
    task_in = task.shape[1]
    small_in = task_in + 3 + 6
    off = _slab128_layout(small_in)
    Bp = max(8, _round8(B))

    def pad_rows(x):
        if x.shape[0] == Bp:
            return x
        return jnp.pad(x, ((0, Bp - x.shape[0]),) + ((0, 0),) * (x.ndim - 1))

    pcs_p = pad_rows(pcs)
    cp1_p, task_p, dir1_p, noise_p = (pad_rows(t) for t in (cp1, task, dir1, noise))
    # all point rows + the Bp cp1 rows -> one per-point matmul inside the kernel
    pts_ext = jnp.concatenate([pcs_p.reshape(Bp * N, 3), cp1_p], axis=0)
    # [task | cp1 | dir1 | noise] packed into one small DMA
    small = jnp.concatenate([task_p, cp1_p, dir1_p, noise_p], axis=1)

    kernel = functools.partial(fused_forward_kernel, n_points=N, z_dim=z_dim,
                               small_in=small_in, off=off)
    vmem = pl.BlockSpec(memory_space=pltpu.MemorySpace.VMEM)
    out = pl.pallas_call(
        kernel,
        out_shape=jax.ShapeDtypeStruct((Bp, OUT_W), jnp.float32),
        in_specs=[vmem] * 4,
        out_specs=vmem,
    )(pts_ext, small, params["slab128"], params["slab256"])

    mu = out[:B, :z_dim]
    logvar = out[:B, z_dim:2 * z_dim]
    recon_dir1 = out[:B, HID:HID + 6]
    return recon_dir1, mu, logvar


# ------------------------------ parameters ---------------------------------- #

def init_network(key, feat_dim, task_feat_dim, cp_feat_dim, dir_feat_dim,
                 z_dim, task_input_dim):
    assert 2 * z_dim <= HID and feat_dim <= HID
    assert task_feat_dim + cp_feat_dim + dir_feat_dim <= HID
    tf, cf, df, ti = task_feat_dim, cp_feat_dim, dir_feat_dim, task_input_dim
    small_in = ti + 3 + 6
    off = _slab128_layout(small_in)
    keys = jax.random.split(key, 16)

    def lin(k, i, o, scale=0.1):
        kw, kb = jax.random.split(k)
        return (scale * jax.random.normal(kw, (i, o), jnp.float32),
                scale * jax.random.normal(kb, (o,), jnp.float32))

    # --- PointNet2 surrogate + exact fc_layer (eval BatchNorm folded) ---
    w0_rep = 0.1 * jax.random.normal(keys[0], (6, HID), jnp.float32)
    w0 = w0_rep[:3] + w0_rep[3:]            # pcs.repeat(1,1,2) folded offline
    b0 = 0.1 * jax.random.normal(keys[1], (HID,), jnp.float32)
    wfc = 0.1 * jax.random.normal(keys[2], (HID, feat_dim), jnp.float32)
    gamma = jnp.ones((feat_dim,), jnp.float32)
    beta = jnp.zeros((feat_dim,), jnp.float32)
    mean = jnp.zeros((feat_dim,), jnp.float32)
    var = jnp.ones((feat_dim,), jnp.float32)
    bn_scale = gamma * jax.lax.rsqrt(var + BN_EPS)
    wfc = wfc * bn_scale
    bfc = beta - mean * bn_scale

    wt, bt = lin(keys[3], ti, tf)
    wc, bc = lin(keys[4], 3, cf)
    wd, bd = lin(keys[5], 6, df)

    enc_in = feat_dim + tf + cf + df
    ew1, eb1 = lin(keys[6], enc_in, HID)
    ew2, eb2 = lin(keys[7], HID, z_dim)
    ew3, eb3 = lin(keys[8], z_dim, z_dim)
    wmu, bmu = lin(keys[9], z_dim, z_dim)
    wlv, blv = lin(keys[10], z_dim, z_dim)

    dec_in = feat_dim + tf + cf + z_dim
    dw1, db1 = lin(keys[11], dec_in, HID)
    dw2, db2 = lin(keys[12], HID, 6)

    # ---------------- 128-lane parameter slab ----------------
    s = jnp.zeros((off["rows"], HID), jnp.float32)
    row = lambda s, r, v: s.at[r, :v.shape[0]].set(v)
    s = row(s, off["b0"], b0)
    s = row(s, off["eb1"], eb1)
    s = row(s, off["db1"], db1)
    s = s.at[off["bmulv"], :z_dim].set(bmu)
    s = s.at[off["bmulv"], z_dim:2 * z_dim].set(blv)
    s = row(s, off["db2"], db2)
    s = row(s, off["bfc"], bfc)
    s = row(s, off["eb2"], eb2)
    s = row(s, off["eb3"], eb3)
    s = s.at[off["bfeat"], :tf].set(bt)
    s = s.at[off["bfeat"], tf:tf + cf].set(bc)
    s = s.at[off["bfeat"], tf + cf:tf + cf + df].set(bd)
    s = s.at[off["w0"]:off["w0"] + 3, :].set(w0)
    # block-diagonal [mlp_task | mlp_cp | mlp_dir]
    s = s.at[off["wfeat"]:off["wfeat"] + ti, 0:tf].set(wt)
    s = s.at[off["wfeat"] + ti:off["wfeat"] + ti + 3, tf:tf + cf].set(wc)
    s = s.at[off["wfeat"] + ti + 3:off["wfeat"] + ti + 9, tf + cf:tf + cf + df].set(wd)
    # lane/K zero-padded dense weights (padding keeps every result lane exact)
    s = s.at[off["wfc"]:off["wfc"] + HID, :feat_dim].set(wfc)
    s = s.at[off["ew2"]:off["ew2"] + HID, :z_dim].set(ew2)
    s = s.at[off["ew3"]:off["ew3"] + z_dim, :z_dim].set(ew3)
    s = s.at[off["wmulv"]:off["wmulv"] + z_dim, :z_dim].set(wmu)
    s = s.at[off["wmulv"]:off["wmulv"] + z_dim, z_dim:2 * z_dim].set(wlv)
    s = s.at[off["wzdec"]:off["wzdec"] + z_dim, :].set(dw1[feat_dim + tf + cf:, :])
    s = s.at[off["dw2"]:off["dw2"] + HID, :6].set(dw2)

    # ------------- 256-lane encoder/decoder layer-1 slab -------------
    # rows   0:128 : contribution of net1_full  -> [ew1(net1) | dw1(net1)]
    # rows 128:256 : contribution of feats_full -> [ew1(task|cp|dir) | dw1(task|cp)]
    s2 = jnp.zeros((2 * HID, 2 * HID), jnp.float32)
    s2 = s2.at[0:feat_dim, 0:HID].set(ew1[0:feat_dim])
    s2 = s2.at[0:feat_dim, HID:].set(dw1[0:feat_dim])
    r = HID
    s2 = s2.at[r:r + tf, 0:HID].set(ew1[feat_dim:feat_dim + tf])
    s2 = s2.at[r:r + tf, HID:].set(dw1[feat_dim:feat_dim + tf])
    s2 = s2.at[r + tf:r + tf + cf, 0:HID].set(ew1[feat_dim + tf:feat_dim + tf + cf])
    s2 = s2.at[r + tf:r + tf + cf, HID:].set(dw1[feat_dim + tf:feat_dim + tf + cf])
    s2 = s2.at[r + tf + cf:r + tf + cf + df, 0:HID].set(ew1[feat_dim + tf + cf:enc_in])
    # decoder has no dir1 input -> its rows stay zero

    return {"slab128": s, "slab256": s2}


# --------------------------------- main ------------------------------------- #

if __name__ == "__main__":
    B, N = 2, 64
    feat_dim, task_feat_dim, cp_feat_dim, dir_feat_dim = 32, 16, 16, 16
    z_dim, task_input_dim = 32, 3

    key = jax.random.PRNGKey(0)
    kp, kpcs, ktask, kcp, kdir, knoise = jax.random.split(key, 6)

    params = init_network(kp, feat_dim, task_feat_dim, cp_feat_dim,
                          dir_feat_dim, z_dim, task_input_dim)

    pcs = jax.random.normal(kpcs, (B, N, 3), jnp.float32)
    task = jax.random.normal(ktask, (B, task_input_dim), jnp.float32)
    cp1 = jax.random.normal(kcp, (B, 3), jnp.float32)
    dir1 = jax.random.normal(kdir, (B, 6), jnp.float32)
    # torch.randn(*mu.shape) reparameterization noise, made deterministic here
    noise = jax.random.normal(knoise, (B, z_dim), jnp.float32)

    recon_dir1, mu, logvar = jax.block_until_ready(
        jax.jit(network_forward)(params, pcs, task, cp1, dir1, noise)
    )

    assert recon_dir1.shape == (B, 6)
    assert mu.shape == (B, z_dim)
    assert logvar.shape == (B, z_dim)
    assert all(bool(jnp.all(jnp.isfinite(t))) for t in (recon_dir1, mu, logvar))
    print("KERNEL_OK")
</pallas_src>

<mosaic_0001>
module attributes {stable_mosaic.version = 11 : i64} {
  func.func @fused_forward_kernel(%arg0: memref<520x3xf32, #tpu.memory_space<vmem>>, %arg1: memref<8x44xf32, #tpu.memory_space<vmem>>, %arg2: memref<808x128xf32, #tpu.memory_space<vmem>>, %arg3: memref<256x256xf32, #tpu.memory_space<vmem>>, %arg4: memref<8x256xf32, #tpu.memory_space<vmem>>) attributes {dimension_semantics = [], scalar_prefetch = 0 : i64, scratch_operands = 0 : i64, tpu.core_type = #tpu.core_type<tc>} {
    %c16 = arith.constant 16 : index
    %c0 = arith.constant 0 : index
    %0 = vector.load %arg2[%c16, %c0] : memref<808x128xf32, #tpu.memory_space<vmem>>, vector<3x128xf32>
    %c0_0 = arith.constant 0 : index
    %c0_1 = arith.constant 0 : index
    %1 = vector.load %arg2[%c0_0, %c0_1] : memref<808x128xf32, #tpu.memory_space<vmem>>, vector<1x128xf32>
    %c0_2 = arith.constant 0 : index
    %c0_3 = arith.constant 0 : index
    %2 = vector.load %arg0[%c0_2, %c0_3] : memref<520x3xf32, #tpu.memory_space<vmem>>, vector<520x3xf32>
    %3 = arith.truncf %2 : vector<520x3xf32> to vector<520x3xbf16>
    %4 = arith.truncf %0 : vector<3x128xf32> to vector<3x128xbf16>
    %cst = arith.constant dense<0.000000e+00> : vector<520x128xf32>
    %5 = tpu.matmul %3, %4, %cst {dimension_numbers = #tpu.dot_dimension_numbers<[1], [0], [0], [1], [0, 0, 1, 1], [], []>} : vector<520x3xbf16>, vector<3x128xbf16>, vector<520x128xf32> -> vector<520x128xf32>
    %6 = vector.broadcast %1 : vector<1x128xf32> to vector<520x128xf32>
    %7 = arith.addf %5, %6 : vector<520x128xf32>
    %cst_4 = arith.constant 0.000000e+00 : f32
    %8 = vector.broadcast %cst_4 : f32 to vector<520x128xf32>
    %9 = arith.maximumf %7, %8 : vector<520x128xf32>
    %10 = vector.extract_strided_slice %9 {offsets = [512, 0], sizes = [8, 128], strides = [1, 1]} : vector<520x128xf32> to vector<8x128xf32>
    %11 = vector.extract_strided_slice %9 {offsets = [0, 0], sizes = [512, 128], strides = [1, 1]} : vector<520x128xf32> to vector<512x128xf32>
    %12 = vector.shape_cast %11 : vector<512x128xf32> to vector<8x64x128xf32>
    %13 = tpu.iota {dimensions = array<i32: 1>} : vector<8x64x1xi32>
    %c0_i32 = arith.constant 0 : i32
    %14 = vector.broadcast %c0_i32 : i32 to vector<8x64x1xi32>
    %15 = arith.cmpi eq, %13, %14 : vector<8x64x1xi32>
    %cst_5 = arith.constant 0.000000e+00 : f32
    %16 = vector.shape_cast %15 : vector<8x64x1xi1> to vector<8x64x1xi1>
    %17 = vector.broadcast %16 : vector<8x64x1xi1> to vector<8x64x128xi1>
    %18 = vector.broadcast %cst_5 : f32 to vector<8x64x128xf32>
    %19 = arith.select %17, %18, %12 : vector<8x64x128xi1>, vector<8x64x128xf32>
    %cst_6 = arith.constant dense<0xFF800000> : vector<8x128xf32>
    %20 = vector.multi_reduction <maximumf>, %19, %cst_6 [1] : vector<8x64x128xf32> to vector<8x128xf32>
    %21 = arith.maximumf %20, %10 : vector<8x128xf32>
    %22 = arith.addf %10, %21 : vector<8x128xf32>
    %c40 = arith.constant 40 : index
    %c0_7 = arith.constant 0 : index
    %23 = vector.load %arg2[%c40, %c0_7] : memref<808x128xf32, #tpu.memory_space<vmem>>, vector<128x128xf32>
    %cst_8 = arith.constant dense<0.000000e+00> : vector<8x128xf32>
    %24 = tpu.matmul %22, %23, %cst_8 {dimension_numbers = #tpu.dot_dimension_numbers<[1], [0], [0], [1], [0, 0, 1, 1], [], []>} : vector<8x128xf32>, vector<128x128xf32>, vector<8x128xf32> -> vector<8x128xf32>
    %c5 = arith.constant 5 : index
    %c0_9 = arith.constant 0 : index
    %25 = vector.load %arg2[%c5, %c0_9] : memref<808x128xf32, #tpu.memory_space<vmem>>, vector<1x128xf32>
    %26 = vector.broadcast %25 : vector<1x128xf32> to vector<8x128xf32>
    %27 = arith.addf %24, %26 : vector<8x128xf32>
    %cst_10 = arith.constant 0.000000e+00 : f32
    %28 = vector.broadcast %cst_10 : f32 to vector<8x128xf32>
    %29 = arith.maximumf %27, %28 : vector<8x128xf32>
    %c0_11 = arith.constant 0 : index
    %c0_12 = arith.constant 0 : index
    %30 = vector.load %arg1[%c0_11, %c0_12] : memref<8x44xf32, #tpu.memory_space<vmem>>, vector<8x44xf32>
    %31 = vector.extract_strided_slice %30 {offsets = [0, 0], sizes = [8, 12], strides = [1, 1]} : vector<8x44xf32> to vector<8x12xf32>
    %32 = vector.extract_strided_slice %30 {offsets = [0, 12], sizes = [8, 32], strides = [1, 1]} : vector<8x44xf32> to vector<8x32xf32>
    %c24 = arith.constant 24 : index
    %c0_13 = arith.constant 0 : index
    %33 = vector.load %arg2[%c24, %c0_13] : memref<808x128xf32, #tpu.memory_space<vmem>>, vector<12x128xf32>
    %cst_14 = arith.constant dense<0.000000e+00> : vector<8x128xf32>
    %34 = tpu.matmul %31, %33, %cst_14 {dimension_numbers = #tpu.dot_dimension_numbers<[1], [0], [0], [1], [0, 0, 1, 1], [], []>} : vector<8x12xf32>, vector<12x128xf32>, vector<8x128xf32> -> vector<8x128xf32>
    %c8 = arith.constant 8 : index
    %c0_15 = arith.constant 0 : index
    %35 = vector.load %arg2[%c8, %c0_15] : memref<808x128xf32, #tpu.memory_space<vmem>>, vector<1x128xf32>
    %36 = vector.broadcast %35 : vector<1x128xf32> to vector<8x128xf32>
    %37 = arith.addf %34, %36 : vector<8x128xf32>
    %c0_16 = arith.constant 0 : index
    %c0_17 = arith.constant 0 : index
    %38 = vector.load %arg3[%c0_16, %c0_17] : memref<256x256xf32, #tpu.memory_space<vmem>>, vector<128x256xf32>
    %cst_18 = arith.constant dense<0.000000e+00> : vector<8x256xf32>
    %39 = tpu.matmul %29, %38, %cst_18 {dimension_numbers = #tpu.dot_dimension_numbers<[1], [0], [0], [1], [0, 0, 1, 1], [], []>} : vector<8x128xf32>, vector<128x256xf32>, vector<8x256xf32> -> vector<8x256xf32>
    %c128 = arith.constant 128 : index
    %c0_19 = arith.constant 0 : index
    %40 = vector.load %arg3[%c128, %c0_19] : memref<256x256xf32, #tpu.memory_space<vmem>>, vector<128x256xf32>
    %cst_20 = arith.constant dense<0.000000e+00> : vector<8x256xf32>
    %41 = tpu.matmul %37, %40, %cst_20 {dimension_numbers = #tpu.dot_dimension_numbers<[1], [0], [0], [1], [0, 0, 1, 1], [], []>} : vector<8x128xf32>, vector<128x256xf32>, vector<8x256xf32> -> vector<8x256xf32>
    %42 = arith.addf %39, %41 : vector<8x256xf32>
    %43 = vector.extract_strided_slice %42 {offsets = [0, 0], sizes = [8, 128], strides = [1, 1]} : vector<8x256xf32> to vector<8x128xf32>
    %c1 = arith.constant 1 : index
    %c0_21 = arith.constant 0 : index
    %44 = vector.load %arg2[%c1, %c0_21] : memref<808x128xf32, #tpu.memory_space<vmem>>, vector<1x128xf32>
    %45 = vector.broadcast %44 : vector<1x128xf32> to vector<8x128xf32>
    %46 = arith.addf %43, %45 : vector<8x128xf32>
    %cst_22 = arith.constant 0.000000e+00 : f32
    %47 = vector.broadcast %cst_22 : f32 to vector<8x128xf32>
    %48 = arith.cmpf ogt, %46, %47 : vector<8x128xf32>
    %cst_23 = arith.constant 0.00999999977 : f32
    %49 = vector.broadcast %cst_23 : f32 to vector<8x128xf32>
    %50 = arith.mulf %49, %46 : vector<8x128xf32>
    %51 = arith.select %48, %46, %50 : vector<8x128xi1>, vector<8x128xf32>
    %52 = vector.extract_strided_slice %42 {offsets = [0, 128], sizes = [8, 128], strides = [1, 1]} : vector<8x256xf32> to vector<8x128xf32>
    %c2 = arith.constant 2 : index
    %c0_24 = arith.constant 0 : index
    %53 = vector.load %arg2[%c2, %c0_24] : memref<808x128xf32, #tpu.memory_space<vmem>>, vector<1x128xf32>
    %54 = vector.broadcast %53 : vector<1x128xf32> to vector<8x128xf32>
    %55 = arith.addf %52, %54 : vector<8x128xf32>
    %c168 = arith.constant 168 : index
    %c0_25 = arith.constant 0 : index
    %56 = vector.load %arg2[%c168, %c0_25] : memref<808x128xf32, #tpu.memory_space<vmem>>, vector<128x128xf32>
    %cst_26 = arith.constant dense<0.000000e+00> : vector<8x128xf32>
    %57 = tpu.matmul %51, %56, %cst_26 {dimension_numbers = #tpu.dot_dimension_numbers<[1], [0], [0], [1], [0, 0, 1, 1], [], []>} : vector<8x128xf32>, vector<128x128xf32>, vector<8x128xf32> -> vector<8x128xf32>
    %c6 = arith.constant 6 : index
    %c0_27 = arith.constant 0 : index
    %58 = vector.load %arg2[%c6, %c0_27] : memref<808x128xf32, #tpu.memory_space<vmem>>, vector<1x128xf32>
    %59 = vector.broadcast %58 : vector<1x128xf32> to vector<8x128xf32>
    %60 = arith.addf %57, %59 : vector<8x128xf32>
    %cst_28 = arith.constant 0.000000e+00 : f32
    %61 = vector.broadcast %cst_28 : f32 to vector<8x128xf32>
    %62 = arith.cmpf ogt, %60, %61 : vector<8x128xf32>
    %cst_29 = arith.constant 0.00999999977 : f32
    %63 = vector.broadcast %cst_29 : f32 to vector<8x128xf32>
    %64 = arith.mulf %63, %60 : vector<8x128xf32>
    %65 = arith.select %62, %60, %64 : vector<8x128xi1>, vector<8x128xf32>
    %c296 = arith.constant 296 : index
    %c0_30 = arith.constant 0 : index
    %66 = vector.load %arg2[%c296, %c0_30] : memref<808x128xf32, #tpu.memory_space<vmem>>, vector<128x128xf32>
    %cst_31 = arith.constant dense<0.000000e+00> : vector<8x128xf32>
    %67 = tpu.matmul %65, %66, %cst_31 {dimension_numbers = #tpu.dot_dimension_numbers<[1], [0], [0], [1], [0, 0, 1, 1], [], []>} : vector<8x128xf32>, vector<128x128xf32>, vector<8x128xf32> -> vector<8x128xf32>
    %c7 = arith.constant 7 : index
    %c0_32 = arith.constant 0 : index
    %68 = vector.load %arg2[%c7, %c0_32] : memref<808x128xf32, #tpu.memory_space<vmem>>, vector<1x128xf32>
    %69 = vector.broadcast %68 : vector<1x128xf32> to vector<8x128xf32>
    %70 = arith.addf %67, %69 : vector<8x128xf32>
    %c424 = arith.constant 424 : index
    %c0_33 = arith.constant 0 : index
    %71 = vector.load %arg2[%c424, %c0_33] : memref<808x128xf32, #tpu.memory_space<vmem>>, vector<128x128xf32>
    %cst_34 = arith.constant dense<0.000000e+00> : vector<8x128xf32>
    %72 = tpu.matmul %70, %71, %cst_34 {dimension_numbers = #tpu.dot_dimension_numbers<[1], [0], [0], [1], [0, 0, 1, 1], [], []>} : vector<8x128xf32>, vector<128x128xf32>, vector<8x128xf32> -> vector<8x128xf32>
    %c3 = arith.constant 3 : index
    %c0_35 = arith.constant 0 : index
    %73 = vector.load %arg2[%c3, %c0_35] : memref<808x128xf32, #tpu.memory_space<vmem>>, vector<1x128xf32>
    %74 = vector.broadcast %73 : vector<1x128xf32> to vector<8x128xf32>
    %75 = arith.addf %72, %74 : vector<8x128xf32>
    %76 = vector.extract_strided_slice %75 {offsets = [0, 0], sizes = [8, 32], strides = [1, 1]} : vector<8x128xf32> to vector<8x32xf32>
    %77 = vector.extract_strided_slice %75 {offsets = [0, 32], sizes = [8, 32], strides = [1, 1]} : vector<8x128xf32> to vector<8x32xf32>
    %cst_36 = arith.constant 5.000000e-01 : f32
    %78 = vector.broadcast %cst_36 : f32 to vector<8x32xf32>
    %79 = arith.mulf %78, %77 : vector<8x32xf32>
    %80 = math.exp %79 : vector<8x32xf32>
    %81 = arith.mulf %80, %32 : vector<8x32xf32>
    %82 = arith.addf %76, %81 : vector<8x32xf32>
    %c552 = arith.constant 552 : index
    %c0_37 = arith.constant 0 : index
    %83 = vector.load %arg2[%c552, %c0_37] : memref<808x128xf32, #tpu.memory_space<vmem>>, vector<32x128xf32>
    %cst_38 = arith.constant dense<0.000000e+00> : vector<8x128xf32>
    %84 = tpu.matmul %82, %83, %cst_38 {dimension_numbers = #tpu.dot_dimension_numbers<[1], [0], [0], [1], [0, 0, 1, 1], [], []>} : vector<8x32xf32>, vector<32x128xf32>, vector<8x128xf32> -> vector<8x128xf32>
    %85 = arith.addf %55, %84 : vector<8x128xf32>
    %c680 = arith.constant 680 : index
    %c0_39 = arith.constant 0 : index
    %86 = vector.load %arg2[%c680, %c0_39] : memref<808x128xf32, #tpu.memory_space<vmem>>, vector<128x128xf32>
    %cst_40 = arith.constant dense<0.000000e+00> : vector<8x128xf32>
    %87 = tpu.matmul %85, %86, %cst_40 {dimension_numbers = #tpu.dot_dimension_numbers<[1], [0], [0], [1], [0, 0, 1, 1], [], []>} : vector<8x128xf32>, vector<128x128xf32>, vector<8x128xf32> -> vector<8x128xf32>
    %c4 = arith.constant 4 : index
    %c0_41 = arith.constant 0 : index
    %88 = vector.load %arg2[%c4, %c0_41] : memref<808x128xf32, #tpu.memory_space<vmem>>, vector<1x128xf32>
    %89 = vector.broadcast %88 : vector<1x128xf32> to vector<8x128xf32>
    %90 = arith.addf %87, %89 : vector<8x128xf32>
    %c0_42 = arith.constant 0 : index
    %c0_43 = arith.constant 0 : index
    %91 = vector.load %arg4[%c0_42, %c0_43] : memref<8x256xf32, #tpu.memory_space<vmem>>, vector<8x128xf32>
    tpu.vector_store %arg4[%c0_42, %c0_43], %75 {strides = array<i32>} : memref<8x256xf32, #tpu.memory_space<vmem>>, vector<8x128xf32>,
    %c0_44 = arith.constant 0 : index
    %c128_45 = arith.constant 128 : index
    %92 = vector.load %arg4[%c0_44, %c128_45] : memref<8x256xf32, #tpu.memory_space<vmem>>, vector<8x128xf32>
    tpu.vector_store %arg4[%c0_44, %c128_45], %90 {strides = array<i32>} : memref<8x256xf32, #tpu.memory_space<vmem>>, vector<8x128xf32>,
    return
  }
}

</mosaic_0001>

<bundles_post_ra>
// kernel: network_forward.1
= control target key start
LH: loop header
LB: loop body
LE: loop exit
PB: predicated region body
PF: predicated region fallthrough
CT: control target
= control target key end

     0   :  { %vm223_vm0 = vcmask 1040384   ;;  %vm224_vm1 = vcmask 1041408   ;;  %v2414_v0 = vmov 0.0   ;;  %v2415_v2 = vmov 65535   ;;  %s2419_s7 = smov 20   ;;  %s2420_s21 = smov 96   ;;  %s3410_s2 = inlined_call_operand.vmem [shape: f32[808,128], index: 2, kind: input, shape index: {}]   ;;  %s3411_s0 = inlined_call_operand.vmem [shape: f32[520,3], index: 0, kind: input, shape index: {}]   ;;  %s3412_s3 = inlined_call_operand.vmem [shape: f32[256,256], index: 3, kind: input, shape index: {}]   ;;  %s3413_s1 = inlined_call_operand.vmem [shape: f32[8,44], index: 1, kind: input, shape index: {}]   ;;  %s3414_s4 = inlined_call_operand.vmem [shape: f32[8,256], index: 4, kind: output, shape index: {}]  }
   0x1   :  { %1882 = vmatprep.subr.bf16.mxu0 %v2414_v0  ;;  %v18_v1 = vld [vmem:[%s3410_s2 + $0x10] sm:$0x7]  ;;  %v225_v3 = vsel %vm223_vm0, 4294967295, %v2415_v2  ;;  %vm2416_vm2 = vmmov 0   ;;  %v20_v6 = vld [vmem:[%s3411_s0] sm:$0xff]  ;;  %v21_v7 = vld [vmem:[%s3411_s0 + $0x8] sm:$0xff] }
   0x2   :  { %v118_v4 = vpack.c.bf16 %v18_v1, %v18_v1  ;;  %v226_v5 = vsel %vm224_vm1, %v225_v3, 0  ;;  %1884 = vmatprep.mubr.msk.bf16.mxu0 %vm2416_vm2, %v2414_v0  ;;  %2048 = vmatprep.mubr.msk.f32.mxu1 %vm2416_vm2, %v2414_v0  ;;  %v85_v9 = vpack.c.bf16 %v21_v7, %v20_v6  ;;  %vm123_vm3 = vcmask 23552   ;;  %v22_v10 = vld [vmem:[%s3411_s0 + $0x10] sm:$0xff]  ;;  %v23_v11 = vld [vmem:[%s3411_s0 + $0x18] sm:$0xff]  ;;  %v24_v13 = vld [vmem:[%s3411_s0 + $0x20] sm:$0xff] }
   0x3   :  { %v86_v12 = vpack.c.bf16 %v23_v11, %v22_v10  ;;  %v25_v14 = vld [vmem:[%s3411_s0 + $0x28] sm:$0xff]  ;;  %v26_v16 = vld [vmem:[%s3411_s0 + $0x30] sm:$0xff]  ;;  %v27_v17 = vld [vmem:[%s3411_s0 + $0x38] sm:$0xff]  ;;  %vm825_vm5 = vcmask 1041409   ;;  %vm828_vm6 = vcmask 1042434   ;;  %vm831_vm7 = vcmask 1043459  }
   0x4   :  { %v228_v8 = vand.u32 %v226_v5, %v118_v4  ;;  %v87_v15 = vpack.c.bf16 %v25_v14, %v24_v13  ;;  %v88_v18 = vpack.c.bf16 %v27_v17, %v26_v16  ;;  %v28_v19 = vld [vmem:[%s3411_s0 + $0x40] sm:$0xff]  ;;  %v29_v20 = vld [vmem:[%s3411_s0 + $0x48] sm:$0xff]  ;;  %v30_v22 = vld [vmem:[%s3411_s0 + $0x50] sm:$0xff]  ;;  %vm834_vm8 = vcmask 1044484  }
   0x5   :  { %v89_v21 = vpack.c.bf16 %v29_v20, %v28_v19  ;;  %v31_v23 = vld [vmem:[%s3411_s0 + $0x58] sm:$0xff]  ;;  %v32_v25 = vld [vmem:[%s3411_s0 + $0x60] sm:$0xff]  ;;  %v33_v26 = vld [vmem:[%s3411_s0 + $0x68] sm:$0xff]  ;;  %vm837_vm9 = vcmask 1045509   ;;  %vm840_vm10 = vcmask 1046534   ;;  %vm843_vm11 = vcmask 1047559  }
   0x6   :  { %1883 = vmatpush3.bf16.msra.mxu0 %v228_v8  ;;  %v90_v24 = vpack.c.bf16 %v31_v23, %v30_v22  ;;  %v91_v27 = vpack.c.bf16 %v33_v26, %v32_v25  ;;  %v34_v28 = vld [vmem:[%s3411_s0 + $0x70] sm:$0xff]  ;;  %v35_v29 = vld [vmem:[%s3411_s0 + $0x78] sm:$0xff]  ;;  %v36_v31 = vld [vmem:[%s3411_s0 + $0x80] sm:$0xff]  ;;  %v591_v25 = vlaneseq  ;;  %vm951_vm12 = vcmask 1043456  }
   0x7   :  { %v92_v30 = vpack.c.bf16 %v35_v29, %v34_v28  ;;  %v37_v32 = vld [vmem:[%s3411_s0 + $0x88] sm:$0xff]  ;;  %v38_v34 = vld [vmem:[%s3411_s0 + $0x90] sm:$0xff]  ;;  %v39_v35 = vld [vmem:[%s3411_s0 + $0x98] sm:$0xff]  ;;  %vm2418_vm13 = vmmov 1   ;;  %vm947_vm15 = vcmask 97280  }
   0x8   :  { %v93_v33 = vpack.c.bf16 %v37_v32, %v36_v31  ;;  %v94_v36 = vpack.c.bf16 %v39_v35, %v38_v34  ;;  %v40_v37 = vld [vmem:[%s3411_s0 + $0xa0] sm:$0xff]  ;;  %v41_v38 = vld [vmem:[%s3411_s0 + $0xa8] sm:$0xff]  ;;  %v42_v40 = vld [vmem:[%s3411_s0 + $0xb0] sm:$0xff] }
   0x9   :  { %1885 = vmatmul.mubr.msk.bf16.vlgmr.msra.gmra.mrb[0].mxu0 %vm123_vm3, %v85_v9  ;;  %v95_v39 = vpack.c.bf16 %v41_v38, %v40_v37  ;;  %v43_v41 = vld [vmem:[%s3411_s0 + $0xb8] sm:$0xff]  ;;  %v44_v43 = vld [vmem:[%s3411_s0 + $0xc0] sm:$0xff]  ;;  %v45_v44 = vld [vmem:[%s3411_s0 + $0xc8] sm:$0xff] }
   0xa   :  { %1888 = vmatprep.mubr.msk.bf16.mxu0 %vm2416_vm2, %v2414_v0  ;;  %v96_v42 = vpack.c.bf16 %v43_v41, %v42_v40  ;;  %v97_v45 = vpack.c.bf16 %v45_v44, %v44_v43  ;;  %v46_v46 = vld [vmem:[%s3411_s0 + $0xd0] sm:$0xff]  ;;  %v47_v47 = vld [vmem:[%s3411_s0 + $0xd8] sm:$0xff]  ;;  %v48_v49 = vld [vmem:[%s3411_s0 + $0xe0] sm:$0xff] }
   0xb   :  { %v98_v48 = vpack.c.bf16 %v47_v47, %v46_v46  ;;  %v49_v50 = vld [vmem:[%s3411_s0 + $0xe8] sm:$0xff]  ;;  %v50_v52 = vld [vmem:[%s3411_s0 + $0xf0] sm:$0xff]  ;;  %v51_v53 = vld [vmem:[%s3411_s0 + $0xf8] sm:$0xff] }
   0xc   :  { %v99_v51 = vpack.c.bf16 %v49_v50, %v48_v49  ;;  %v100_v54 = vpack.c.bf16 %v51_v53, %v50_v52  ;;  %v52_v55 = vld [vmem:[%s3411_s0 + $0x100] sm:$0xff]  ;;  %v53_v56 = vld [vmem:[%s3411_s0 + $0x108] sm:$0xff]  ;;  %v54_v58 = vld [vmem:[%s3411_s0 + $0x110] sm:$0xff] }
   0xd   :  { %v101_v57 = vpack.c.bf16 %v53_v56, %v52_v55  ;;  %v55_v59 = vld [vmem:[%s3411_s0 + $0x118] sm:$0xff]  ;;  %v56_v61 = vld [vmem:[%s3411_s0 + $0x120] sm:$0xff]  ;;  %v57_v62 = vld [vmem:[%s3411_s0 + $0x128] sm:$0xff] }
   0xe   :  { %v102_v60 = vpack.c.bf16 %v55_v59, %v54_v58  ;;  %v103_v63 = vpack.c.bf16 %v57_v62, %v56_v61  ;;  %v58_v1 = vld [vmem:[%s3411_s0 + $0x130] sm:$0xff]  ;;  %v59_v2 = vld [vmem:[%s3411_s0 + $0x138] sm:$0xff]  ;;  %v60_v4 = vld [vmem:[%s3411_s0 + $0x140] sm:$0xff] }
   0xf   :  { %v104_v3 = vpack.c.bf16 %v59_v2, %v58_v1  ;;  %v61_v5 = vld [vmem:[%s3411_s0 + $0x148] sm:$0xff]  ;;  %v62_v7 = vld [vmem:[%s3411_s0 + $0x150] sm:$0xff]  ;;  %v63_v8 = vld [vmem:[%s3411_s0 + $0x158] sm:$0xff] }
  0x10   :  { %v105_v6 = vpack.c.bf16 %v61_v5, %v60_v4  ;;  %v106_v9 = vpack.c.bf16 %v63_v8, %v62_v7  ;;  %v64_v10 = vld [vmem:[%s3411_s0 + $0x160] sm:$0xff]  ;;  %v65_v11 = vld [vmem:[%s3411_s0 + $0x168] sm:$0xff]  ;;  %v66_v13 = vld [vmem:[%s3411_s0 + $0x170] sm:$0xff] }
  0x11   :  { %1889 = vmatmul.mubr.msk.bf16.gmra.mrb[4].mxu0 %vm123_vm3, %v86_v12  ;;  %v107_v12 = vpack.c.bf16 %v65_v11, %v64_v10  ;;  %v67_v14 = vld [vmem:[%s3411_s0 + $0x178] sm:$0xff]  ;;  %v68_v16 = vld [vmem:[%s3411_s0 + $0x180] sm:$0xff]  ;;  %v69_v17 = vld [vmem:[%s3411_s0 + $0x188] sm:$0xff] }
  0x12   :  { %1892 = vmatprep.mubr.msk.bf16.mxu0 %vm2416_vm2, %v2414_v0  ;;  %v70_v19 = vld [vmem:[%s3411_s0 + $0x190] sm:$0xff]  ;;  %v71_v20 = vld [vmem:[%s3411_s0 + $0x198] sm:$0xff]  ;;  %v72_v22 = vld [vmem:[%s3411_s0 + $0x1a0] sm:$0xff] }
  0x13   :  { %v73_v23 = vld [vmem:[%s3411_s0 + $0x1a8] sm:$0xff]  ;;  %v2698_v26 = vld [vmem:[%s3410_s2] ss:$0 sm:$0xff]  ;;  %v74_v28 = vld [vmem:[%s3411_s0 + $0x1b0] sm:$0xff] }
  0x14   :  { %v75_v29 = vld [vmem:[%s3411_s0 + $0x1b8] sm:$0xff]  ;;  %v76_v40 = vld [vmem:[%s3411_s0 + $0x1c0] sm:$0xff]  ;;  %v77_v41 = vld [vmem:[%s3411_s0 + $0x1c8] sm:$0xff] }
  0x15   :  { %v113_v46 = vpack.c.bf16 %v77_v41, %v76_v40  ;;  %v78_v53 = vld [vmem:[%s3411_s0 + $0x1d0] sm:$0xff]  ;;  %v81_v4 = vld [vmem:[%s3411_s0 + $0x1e8] sm:$0xff]  ;;  %vm2235_vm14 = vmpackc.low %vm951_vm12, %vm2418_vm13 }
  0x19   :  { %1893 = vmatmul.mubr.msk.bf16.gmra.mrb[8].mxu0 %vm123_vm3, %v87_v15  ;;  %v108_v15 = vpack.c.bf16 %v67_v14, %v66_v13 }
  0x1a   :  { %1896 = vmatprep.mubr.msk.bf16.mxu0 %vm2416_vm2, %v2414_v0 }
  0x21   :  { %1897 = vmatmul.mubr.msk.bf16.gmra.mrb[12].mxu0 %vm123_vm3, %v88_v18  ;;  %v109_v18 = vpack.c.bf16 %v69_v17, %v68_v16  ;;  %v82_v16 = vld [vmem:[%s3411_s0 + $0x1f0] sm:$0xff]  ;;  %v83_v17 = vld [vmem:[%s3411_s0 + $0x1f8] sm:$0xff] }
  0x22   :  { %1900 = vmatprep.mubr.msk.bf16.mxu0 %vm2416_vm2, %v2414_v0 }
  0x29   :  { %1901 = vmatmul.mubr.msk.bf16.gmra.mrb[16].mxu0 %vm123_vm3, %v89_v21  ;;  %v110_v21 = vpack.c.bf16 %v71_v20, %v70_v19 }
  0x2a   :  { %1904 = vmatprep.mubr.msk.bf16.mxu0 %vm2416_vm2, %v2414_v0 }
  0x31   :  { %1905 = vmatmul.mubr.msk.bf16.gmra.mrb[20].mxu0 %vm123_vm3, %v90_v24  ;;  %v111_v24 = vpack.c.bf16 %v73_v23, %v72_v22  ;;  %v116_v22 = vpack.c.bf16 %v83_v17, %v82_v16 }
  0x32   :  { %1908 = vmatprep.mubr.msk.bf16.mxu0 %vm2416_vm2, %v2414_v0 }
  0x39   :  { %1909 = vmatmul.mubr.msk.bf16.gmra.mrb[24].mxu0 %vm123_vm3, %v91_v27  ;;  %v2700_v27 = vshrl.u32 %v591_v25, 7 }
  0x3a   :  { %1912 = vmatprep.mubr.msk.bf16.mxu0 %vm2416_vm2, %v2414_v0 }
  0x3b   :  { %vm600_vm4 = vcmp.eq.s32.totalorder %v2700_v27, 0 }
  0x41   :  { %1913 = vmatmul.mubr.msk.bf16.gmra.mrb[28].mxu0 %vm123_vm3, %v92_v30 }
  0x42   :  { %1916 = vmatprep.mubr.msk.bf16.mxu0 %vm2416_vm2, %v2414_v0 }
  0x49   :  { %1917 = vmatmul.mubr.msk.bf16.gmra.mrb[32].mxu0 %vm123_vm3, %v93_v33  ;;  %v112_v33 = vpack.c.bf16 %v75_v29, %v74_v28 }
  0x4a   :  { %1920 = vmatprep.mubr.msk.bf16.mxu0 %vm2416_vm2, %v2414_v0 }
  0x51   :  { %1921 = vmatmul.mubr.msk.bf16.gmra.mrb[36].mxu0 %vm123_vm3, %v94_v36 }
  0x52   :  { %1924 = vmatprep.mubr.msk.bf16.mxu0 %vm2416_vm2, %v2414_v0 }
  0x59   :  { %1925 = vmatmul.mubr.msk.bf16.gmra.mrb[40].mxu0 %vm123_vm3, %v95_v39 }
  0x5a   :  { %1928 = vmatprep.mubr.msk.bf16.mxu0 %vm2416_vm2, %v2414_v0 }
  0x61   :  { %1929 = vmatmul.mubr.msk.bf16.gmra.mrb[44].mxu0 %vm123_vm3, %v96_v42 }
  0x62   :  { %1932 = vmatprep.mubr.msk.bf16.mxu0 %vm2416_vm2, %v2414_v0 }
  0x69   :  { %1933 = vmatmul.mubr.msk.bf16.gmra.mrb[48].mxu0 %vm123_vm3, %v97_v45 }
  0x6a   :  { %1936 = vmatprep.mubr.msk.bf16.mxu0 %vm2416_vm2, %v2414_v0 }
  0x71   :  { %1937 = vmatmul.mubr.msk.bf16.gmra.mrb[52].mxu0 %vm123_vm3, %v98_v48 }
  0x72   :  { %1940 = vmatprep.mubr.msk.bf16.mxu0 %vm2416_vm2, %v2414_v0 }
  0x79   :  { %1941 = vmatmul.mubr.msk.bf16.gmra.mrb[56].mxu0 %vm123_vm3, %v99_v51 }
  0x7a   :  { %1944 = vmatprep.mubr.msk.bf16.mxu0 %vm2416_vm2, %v2414_v0 }
  0x81   :  { %1945 = vmatmul.mubr.msk.bf16.gmra.mrb[60].mxu0 %vm123_vm3, %v100_v54  ;;  %v79_v54 = vld [vmem:[%s3411_s0 + $0x1d8] sm:$0xff] }
  0x82   :  { %1948 = vmatprep.mubr.msk.bf16.mxu0 %vm2416_vm2, %v2414_v0  ;;  %v114_v59 = vpack.c.bf16 %v79_v54, %v78_v53 }
  0x89   :  { %1949 = vmatmul.mubr.msk.bf16.gmra.mrb[64].mxu0 %vm123_vm3, %v101_v57 }
  0x8a   :  { %1952 = vmatprep.mubr.msk.bf16.mxu0 %vm2416_vm2, %v2414_v0 }
  0x91   :  { %1953 = vmatmul.mubr.msk.bf16.gmra.mrb[68].mxu0 %vm123_vm3, %v102_v60 }
  0x92   :  { %1956 = vmatprep.mubr.msk.bf16.mxu0 %vm2416_vm2, %v2414_v0 }
  0x99   :  { %1957 = vmatmul.mubr.msk.bf16.gmra.mrb[72].mxu0 %vm123_vm3, %v103_v63 }
  0x9a   :  { %1960 = vmatprep.mubr.msk.bf16.mxu0 %vm2416_vm2, %v2414_v0 }
  0xa1   :  { %1961 = vmatmul.mubr.msk.bf16.gmra.mrb[76].mxu0 %vm123_vm3, %v104_v3  ;;  %v80_v3 = vld [vmem:[%s3411_s0 + $0x1e0] sm:$0xff] }
  0xa2   :  { %1964 = vmatprep.mubr.msk.bf16.mxu0 %vm2416_vm2, %v2414_v0 }
  0xa9   :  { %1965 = vmatmul.mubr.msk.bf16.gmra.mrb[80].mxu0 %vm123_vm3, %v105_v6 }
  0xaa   :  { %1968 = vmatprep.mubr.msk.bf16.mxu0 %vm2416_vm2, %v2414_v0 }
  0xb1   :  { %1969 = vmatmul.mubr.msk.bf16.gmra.mrb[84].mxu0 %vm123_vm3, %v106_v9  ;;  %v115_v9 = vpack.c.bf16 %v81_v4, %v80_v3 }
  0xb2   :  { %1972 = vmatprep.mubr.msk.bf16.mxu0 %vm2416_vm2, %v2414_v0 }
  0xb9   :  { %1973 = vmatmul.mubr.msk.bf16.gmra.mrb[88].mxu0 %vm123_vm3, %v107_v12 }
  0xba   :  { %1976 = vmatprep.mubr.msk.bf16.mxu0 %vm2416_vm2, %v2414_v0 }
  0xc1   :  { %1977 = vmatmul.mubr.msk.bf16.gmra.mrb[92].mxu0 %vm123_vm3, %v108_v15 }
  0xc2   :  { %1980 = vmatprep.mubr.msk.bf16.mxu0 %vm2416_vm2, %v2414_v0 }
  0xc9   :  { %1981 = vmatmul.mubr.msk.bf16.gmra.mrb[96].mxu0 %vm123_vm3, %v109_v18 }
  0xca   :  { %1984 = vmatprep.mubr.msk.bf16.mxu0 %vm2416_vm2, %v2414_v0 }
  0xd1   :  { %1985 = vmatmul.mubr.msk.bf16.gmra.mrb[100].mxu0 %vm123_vm3, %v110_v21 }
  0xd2   :  { %1988 = vmatprep.mubr.msk.bf16.mxu0 %vm2416_vm2, %v2414_v0 }
  0xd9   :  { %1989 = vmatmul.mubr.msk.bf16.gmra.mrb[104].mxu0 %vm123_vm3, %v111_v24 }
  0xda   :  { %1992 = vmatprep.mubr.msk.bf16.mxu0 %vm2416_vm2, %v2414_v0 }
  0xdc   :  { %v264_v30 = vpop.f32.mrb[0].mxu0 }
  0xdd   :  { %v265_v31 = vadd.f32 %v2698_v26, %v264_v30  ;;  %v1886_v32 = vpop.f32.mrb[1].mxu0 }
  0xde   :  { %v267_v34 = vpop.f32.mrb[2].mxu0 }
  0xdf   :  { %v526_v35 = vmax.f32 %v265_v31, 0.0  ;;  %v268_v36 = vadd.f32 %v2698_v26, %v267_v34  ;;  %v1887_v37 = vpop.f32.mrb[3].mxu0  ;;  %v84_v31 = vld [vmem:[%s3411_s0 + $0x200] sm:$0xff] }
  0xe1   :  { %v624_v38 = vsel %vm600_vm4, 0.0, %v526_v35  ;;  %v527_v39 = vmax.f32 %v268_v36, 0.0  ;;  %1993 = vmatmul.mubr.msk.bf16.gmra.mrb[108].mxu0 %vm123_vm3, %v112_v33  ;;  %v117_v36 = vpack.c.bf16 %v84_v31, %v84_v31 }
  0xe2   :  { %1996 = vmatprep.mubr.msk.bf16.mxu0 %vm2416_vm2, %v2414_v0 }
  0xe3   :  { %v688_v42 = vmax.f32 %v624_v38, %v527_v39 }
  0xe4   :  { %v272_v43 = vpop.f32.mrb[4].mxu0 }
  0xe5   :  { %v273_v44 = vadd.f32 %v2698_v26, %v272_v43  ;;  %v1890_v45 = vpop.f32.mrb[5].mxu0 }
  0xe6   :  { %v275_v47 = vpop.f32.mrb[6].mxu0 }
  0xe7   :  { %v528_v48 = vmax.f32 %v273_v44, 0.0  ;;  %v276_v49 = vadd.f32 %v2698_v26, %v275_v47  ;;  %v1891_v50 = vpop.f32.mrb[7].mxu0 }
  0xe9   :  { %v689_v51 = vmax.f32 %v688_v42, %v528_v48  ;;  %v529_v52 = vmax.f32 %v276_v49, 0.0  ;;  %1997 = vmatmul.mubr.msk.bf16.gmra.mrb[112].mxu0 %vm123_vm3, %v113_v46 }
  0xea   :  { %2000 = vmatprep.mubr.msk.bf16.mxu0 %vm2416_vm2, %v2414_v0 }
  0xeb   :  { %v690_v55 = vmax.f32 %v689_v51, %v529_v52 }
  0xec   :  { %v280_v56 = vpop.f32.mrb[8].mxu0 }
  0xed   :  { %v281_v57 = vadd.f32 %v2698_v26, %v280_v56  ;;  %v1894_v58 = vpop.f32.mrb[9].mxu0 }
  0xee   :  { %v283_v60 = vpop.f32.mrb[10].mxu0 }
  0xef   :  { %v530_v61 = vmax.f32 %v281_v57, 0.0  ;;  %v284_v62 = vadd.f32 %v2698_v26, %v283_v60  ;;  %v1895_v63 = vpop.f32.mrb[11].mxu0 }
  0xf1   :  { %v691_v1 = vmax.f32 %v690_v55, %v530_v61  ;;  %v531_v2 = vmax.f32 %v284_v62, 0.0  ;;  %2001 = vmatmul.mubr.msk.bf16.gmra.mrb[116].mxu0 %vm123_vm3, %v114_v59 }
  0xf2   :  { %2004 = vmatprep.mubr.msk.bf16.mxu0 %vm2416_vm2, %v2414_v0 }
  0xf3   :  { %v692_v5 = vmax.f32 %v691_v1, %v531_v2 }
  0xf4   :  { %v288_v6 = vpop.f32.mrb[12].mxu0 }
  0xf5   :  { %v289_v7 = vadd.f32 %v2698_v26, %v288_v6  ;;  %v1898_v8 = vpop.f32.mrb[13].mxu0 }
  0xf6   :  { %v291_v10 = vpop.f32.mrb[14].mxu0 }
  0xf7   :  { %v532_v11 = vmax.f32 %v289_v7, 0.0  ;;  %v292_v12 = vadd.f32 %v2698_v26, %v291_v10  ;;  %v1899_v13 = vpop.f32.mrb[15].mxu0 }
  0xf9   :  { %v693_v14 = vmax.f32 %v692_v5, %v532_v11  ;;  %v533_v15 = vmax.f32 %v292_v12, 0.0  ;;  %2005 = vmatmul.mubr.msk.bf16.gmra.mrb[120].mxu0 %vm123_vm3, %v115_v9 }
  0xfa   :  { %2008 = vmatprep.mubr.msk.bf16.mxu0 %vm2416_vm2, %v2414_v0 }
  0xfb   :  { %v2757_v18 = vmax.f32 %v693_v14, %v533_v15 }
  0xfc   :  { %v296_v19 = vpop.f32.mrb[16].mxu0 }
  0xfd   :  { %v297_v20 = vadd.f32 %v2698_v26, %v296_v19  ;;  %v1902_v21 = vpop.f32.mrb[17].mxu0 }
  0xfe   :  { %v299_v23 = vpop.f32.mrb[18].mxu0 }
  0xff   :  { %v534_v24 = vmax.f32 %v297_v20, 0.0  ;;  %v300_v25 = vadd.f32 %v2698_v26, %v299_v23  ;;  %v1903_v28 = vpop.f32.mrb[19].mxu0 }
 0x101   :  { %v632_v29 = vsel %vm600_vm4, 0.0, %v534_v24  ;;  %v535_v30 = vmax.f32 %v300_v25, 0.0  ;;  %2009 = vmatmul.mubr.msk.bf16.gmra.mrb[124].mxu0 %vm123_vm3, %v116_v22 }
 0x102   :  { %2012 = vmatprep.mubr.msk.bf16.mxu0 %vm2416_vm2, %v2414_v0 }
 0x103   :  { %v701_v32 = vmax.f32 %v632_v29, %v535_v30 }
 0x104   :  { %v304_v33 = vpop.f32.mrb[20].mxu0 }
 0x105   :  { %v305_v34 = vadd.f32 %v2698_v26, %v304_v33  ;;  %v1906_v35 = vpop.f32.mrb[21].mxu0 }
 0x106   :  { %v307_v37 = vpop.f32.mrb[22].mxu0 }
 0x107   :  { %v536_v38 = vmax.f32 %v305_v34, 0.0  ;;  %v308_v39 = vadd.f32 %v2698_v26, %v307_v37  ;;  %v1907_v40 = vpop.f32.mrb[23].mxu0 }
 0x109   :  { %v702_v41 = vmax.f32 %v701_v32, %v536_v38  ;;  %v537_v42 = vmax.f32 %v308_v39, 0.0  ;;  %2013 = vmatmul.mubr.msk.bf16.gmra.mrb[128].mxu0 %vm123_vm3, %v117_v36  ;;  %vm1538_vm3 = vcmask 261120  }
 0x10b   :  { %v703_v43 = vmax.f32 %v702_v41, %v537_v42 }
 0x10c   :  { %v312_v44 = vpop.f32.mrb[24].mxu0 }
 0x10d   :  { %v313_v45 = vadd.f32 %v2698_v26, %v312_v44  ;;  %v1910_v46 = vpop.f32.mrb[25].mxu0 }
 0x10e   :  { %v315_v47 = vpop.f32.mrb[26].mxu0 }
 0x10f   :  { %v538_v48 = vmax.f32 %v313_v45, 0.0  ;;  %v316_v49 = vadd.f32 %v2698_v26, %v315_v47  ;;  %v1911_v50 = vpop.f32.mrb[27].mxu0 }
 0x111   :  { %v704_v51 = vmax.f32 %v703_v43, %v538_v48  ;;  %v539_v52 = vmax.f32 %v316_v49, 0.0 }
 0x113   :  { %v705_v53 = vmax.f32 %v704_v51, %v539_v52 }
 0x114   :  { %v320_v54 = vpop.f32.mrb[28].mxu0 }
 0x115   :  { %v321_v55 = vadd.f32 %v2698_v26, %v320_v54  ;;  %v1914_v56 = vpop.f32.mrb[29].mxu0 }
 0x116   :  { %v323_v57 = vpop.f32.mrb[30].mxu0 }
 0x117   :  { %v540_v58 = vmax.f32 %v321_v55, 0.0  ;;  %v324_v59 = vadd.f32 %v2698_v26, %v323_v57  ;;  %v1915_v60 = vpop.f32.mrb[31].mxu0 }
 0x119   :  { %v706_v61 = vmax.f32 %v705_v53, %v540_v58  ;;  %v541_v62 = vmax.f32 %v324_v59, 0.0 }
 0x11b   :  { %v2776_v63 = vmax.f32 %v706_v61, %v541_v62 }
 0x11c   :  { %v328_v1 = vpop.f32.mrb[32].mxu0 }
 0x11d   :  { %v329_v2 = vadd.f32 %v2698_v26, %v328_v1  ;;  %v1918_v3 = vpop.f32.mrb[33].mxu0 }
 0x11e   :  { %v331_v4 = vpop.f32.mrb[34].mxu0 }
 0x11f   :  { %v542_v5 = vmax.f32 %v329_v2, 0.0  ;;  %v332_v6 = vadd.f32 %v2698_v26, %v331_v4  ;;  %v1919_v7 = vpop.f32.mrb[35].mxu0 }
 0x120   :  { %v848_v7 = vld [vmem:[%s3410_s2 + $0x30] sm:$0xff] }
 0x121   :  { %v640_v8 = vsel %vm600_vm4, 0.0, %v542_v5  ;;  %v543_v9 = vmax.f32 %v332_v6, 0.0  ;;  %v847_v6 = vld [vmem:[%s3410_s2 + $0x28] sm:$0xff] }
 0x123   :  { %v714_v10 = vmax.f32 %v640_v8, %v543_v9 }
 0x124   :  { %v336_v11 = vpop.f32.mrb[36].mxu0 }
 0x125   :  { %v337_v12 = vadd.f32 %v2698_v26, %v336_v11  ;;  %v1922_v13 = vpop.f32.mrb[37].mxu0  ;;  %v2210_v11 = vpack.c.bf16 %v848_v7, %v847_v6 }
 0x126   :  { %v339_v14 = vpop.f32.mrb[38].mxu0 }
 0x127   :  { %v544_v15 = vmax.f32 %v337_v12, 0.0  ;;  %v340_v16 = vadd.f32 %v2698_v26, %v339_v14  ;;  %v1923_v17 = vpop.f32.mrb[39].mxu0  ;;  %v2417_v12 = vmov 0.0|0.0  }
 0x128   :  { %2209 = vmatprep.subr.bf16.mxu1 %v2417_v12 }
 0x129   :  { %v715_v19 = vmax.f32 %v714_v10, %v544_v15  ;;  %v545_v20 = vmax.f32 %v340_v16, 0.0  ;;  %2211 = vmatpush3.bf16.msra.mxu1 %v2210_v11  ;;  %v849_v15 = vld [vmem:[%s3410_s2 + $0x38] sm:$0xff]  ;;  %v850_v16 = vld [vmem:[%s3410_s2 + $0x40] sm:$0xff] }
 0x12a   :  { %2212 = vmatprep.subr.bf16.mxu1 %v2417_v12 }
 0x12b   :  { %v716_v21 = vmax.f32 %v715_v19, %v545_v20  ;;  %v2213_v19 = vpack.c.bf16 %v850_v16, %v849_v15 }
 0x12c   :  { %v344_v22 = vpop.f32.mrb[40].mxu0 }
 0x12d   :  { %v345_v23 = vadd.f32 %v2698_v26, %v344_v22  ;;  %v1926_v24 = vpop.f32.mrb[41].mxu0  ;;  %2214 = vmatpush3.bf16.msra.mxu1 %v2213_v19 }
 0x12e   :  { %v347_v25 = vpop.f32.mrb[42].mxu0  ;;  %2215 = vmatprep.subr.bf16.mxu1 %v2417_v12  ;;  %v851_v24 = vld [vmem:[%s3410_s2 + $0x48] sm:$0xff] }
 0x12f   :  { %v546_v28 = vmax.f32 %v345_v23, 0.0  ;;  %v348_v29 = vadd.f32 %v2698_v26, %v347_v25  ;;  %v1927_v30 = vpop.f32.mrb[43].mxu0  ;;  %v852_v25 = vld [vmem:[%s3410_s2 + $0x50] sm:$0xff] }
 0x131   :  { %v717_v31 = vmax.f32 %v716_v21, %v546_v28  ;;  %v547_v32 = vmax.f32 %v348_v29, 0.0 }
 0x133   :  { %v718_v33 = vmax.f32 %v717_v31, %v547_v32  ;;  %v2216_v31 = vpack.c.bf16 %v852_v25, %v851_v24 }
 0x134   :  { %v352_v34 = vpop.f32.mrb[44].mxu0 }
 0x135   :  { %v353_v35 = vadd.f32 %v2698_v26, %v352_v34  ;;  %v1930_v36 = vpop.f32.mrb[45].mxu0  ;;  %2217 = vmatpush3.bf16.msra.mxu1 %v2216_v31  ;;  %v853_v34 = vld [vmem:[%s3410_s2 + $0x58] sm:$0xff] }
 0x136   :  { %v355_v37 = vpop.f32.mrb[46].mxu0  ;;  %2218 = vmatprep.subr.bf16.mxu1 %v2417_v12 }
 0x137   :  { %v548_v38 = vmax.f32 %v353_v35, 0.0  ;;  %v356_v39 = vadd.f32 %v2698_v26, %v355_v37  ;;  %v1931_v40 = vpop.f32.mrb[47].mxu0  ;;  %v854_v35 = vld [vmem:[%s3410_s2 + $0x60] sm:$0xff] }
 0x138   :  { %v2219_v37 = vpack.c.bf16 %v854_v35, %v853_v34 }
 0x139   :  { %v719_v41 = vmax.f32 %v718_v33, %v548_v38  ;;  %v549_v42 = vmax.f32 %v356_v39, 0.0 }
 0x13a   :  { %2220 = vmatpush3.bf16.msra.mxu1 %v2219_v37 }
 0x13b   :  { %v2788_v43 = vmax.f32 %v719_v41, %v549_v42  ;;  %2221 = vmatprep.subr.bf16.mxu1 %v2417_v12  ;;  %v855_v42 = vld [vmem:[%s3410_s2 + $0x68] sm:$0xff] }
 0x13c   :  { %v360_v44 = vpop.f32.mrb[48].mxu0 }
 0x13d   :  { %v361_v45 = vadd.f32 %v2698_v26, %v360_v44  ;;  %v1934_v46 = vpop.f32.mrb[49].mxu0  ;;  %v856_v44 = vld [vmem:[%s3410_s2 + $0x70] sm:$0xff]  ;;  %v721_v27 = vrot.slane %v2788_v43, 4 }
 0x13e   :  { %v363_v47 = vpop.f32.mrb[50].mxu0 }
 0x13f   :  { %v550_v48 = vmax.f32 %v361_v45, 0.0  ;;  %v364_v49 = vadd.f32 %v2698_v26, %v363_v47  ;;  %v1935_v50 = vpop.f32.mrb[51].mxu0 }
 0x141   :  { %v648_v51 = vsel %vm600_vm4, 0.0, %v550_v48  ;;  %v551_v52 = vmax.f32 %v364_v49, 0.0  ;;  %v2222_v48 = vpack.c.bf16 %v856_v44, %v855_v42 }
 0x143   :  { %v727_v53 = vmax.f32 %v648_v51, %v551_v52  ;;  %2223 = vmatpush3.bf16.msra.mxu1 %v2222_v48  ;;  %v857_v51 = vld [vmem:[%s3410_s2 + $0x78] sm:$0xff]  ;;  %v858_v52 = vld [vmem:[%s3410_s2 + $0x80] sm:$0xff] }
 0x144   :  { %v368_v54 = vpop.f32.mrb[52].mxu0  ;;  %2224 = vmatprep.subr.bf16.mxu1 %v2417_v12 }
 0x145   :  { %v369_v55 = vadd.f32 %v2698_v26, %v368_v54  ;;  %v1938_v56 = vpop.f32.mrb[53].mxu0  ;;  %v2225_v54 = vpack.c.bf16 %v858_v52, %v857_v51 }
 0x146   :  { %v371_v57 = vpop.f32.mrb[54].mxu0 }
 0x147   :  { %v552_v58 = vmax.f32 %v369_v55, 0.0  ;;  %v372_v59 = vadd.f32 %v2698_v26, %v371_v57  ;;  %v1939_v60 = vpop.f32.mrb[55].mxu0  ;;  %2226 = vmatpush3.bf16.msra.mxu1 %v2225_v54 }
 0x148   :  { %2227 = vmatprep.subr.bf16.mxu1 %v2417_v12  ;;  %v860_v60 = vld [vmem:[%s3410_s2 + $0x90] sm:$0xff] }
 0x149   :  { %v728_v61 = vmax.f32 %v727_v53, %v552_v58  ;;  %v553_v62 = vmax.f32 %v372_v59, 0.0  ;;  %v859_v59 = vld [vmem:[%s3410_s2 + $0x88] sm:$0xff] }
 0x14b   :  { %v729_v1 = vmax.f32 %v728_v61, %v553_v62 }
 0x14c   :  { %v376_v2 = vpop.f32.mrb[56].mxu0 }
 0x14d   :  { %v377_v3 = vadd.f32 %v2698_v26, %v376_v2  ;;  %v1942_v4 = vpop.f32.mrb[57].mxu0  ;;  %v2228_v2 = vpack.c.bf16 %v860_v60, %v859_v59 }
 0x14e   :  { %v379_v5 = vpop.f32.mrb[58].mxu0  ;;  %v862_v4 = vld [vmem:[%s3410_s2 + $0xa0] sm:$0xff] }
 0x14f   :  { %v554_v8 = vmax.f32 %v377_v3, 0.0  ;;  %v380_v9 = vadd.f32 %v2698_v26, %v379_v5  ;;  %v1943_v10 = vpop.f32.mrb[59].mxu0  ;;  %v861_v3 = vld [vmem:[%s3410_s2 + $0x98] sm:$0xff]  ;;  %2229 = vmatpush3.bf16.msra.mxu1 %v2228_v2 }
 0x150   :  { %v2231_v7 = vpack.c.bf16 %v862_v4, %v861_v3  ;;  %2230 = vmatprep.subr.bf16.mxu1 %v2417_v12 }
 0x151   :  { %v730_v13 = vmax.f32 %v729_v1, %v554_v8  ;;  %v555_v14 = vmax.f32 %v380_v9, 0.0 }
 0x153   :  { %v731_v17 = vmax.f32 %v730_v13, %v555_v14  ;;  %2232 = vmatpush3.bf16.msra.mxu1 %v2231_v7 }
 0x154   :  { %v384_v20 = vpop.f32.mrb[60].mxu0  ;;  %2233 = vmatprep.subr.bf16.mxu1 %v2417_v12 }
 0x155   :  { %v385_v21 = vadd.f32 %v2698_v26, %v384_v20  ;;  %v1946_v22 = vpop.f32.mrb[61].mxu0 }
 0x156   :  { %v387_v23 = vpop.f32.mrb[62].mxu0 }
 0x157   :  { %v556_v28 = vmax.f32 %v385_v21, 0.0  ;;  %v388_v29 = vadd.f32 %v2698_v26, %v387_v23  ;;  %v1947_v30 = vpop.f32.mrb[63].mxu0 }
 0x159   :  { %v732_v32 = vmax.f32 %v731_v17, %v556_v28  ;;  %v557_v33 = vmax.f32 %v388_v29, 0.0 }
 0x15b   :  { %v2828_v36 = vmax.f32 %v732_v32, %v557_v33 }
 0x15c   :  { %v392_v38 = vpop.f32.mrb[64].mxu0 }
 0x15d   :  { %v393_v39 = vadd.f32 %v2698_v26, %v392_v38  ;;  %v1950_v40 = vpop.f32.mrb[65].mxu0 }
 0x15e   :  { %v395_v41 = vpop.f32.mrb[66].mxu0 }
 0x15f   :  { %v558_v45 = vmax.f32 %v393_v39, 0.0  ;;  %v396_v46 = vadd.f32 %v2698_v26, %v395_v41  ;;  %v1951_v47 = vpop.f32.mrb[67].mxu0 }
 0x161   :  { %v656_v49 = vsel %vm600_vm4, 0.0, %v558_v45  ;;  %v559_v50 = vmax.f32 %v396_v46, 0.0 }
 0x163   :  { %v740_v53 = vmax.f32 %v656_v49, %v559_v50 }
 0x164   :  { %v400_v55 = vpop.f32.mrb[68].mxu0 }
 0x165   :  { %v401_v56 = vadd.f32 %v2698_v26, %v400_v55  ;;  %v1954_v57 = vpop.f32.mrb[69].mxu0 }
 0x166   :  { %v403_v58 = vpop.f32.mrb[70].mxu0 }
 0x167   :  { %v560_v61 = vmax.f32 %v401_v56, 0.0  ;;  %v404_v62 = vadd.f32 %v2698_v26, %v403_v58  ;;  %v1955_v1 = vpop.f32.mrb[71].mxu0 }
 0x169   :  { %v741_v5 = vmax.f32 %v740_v53, %v560_v61  ;;  %v561_v6 = vmax.f32 %v404_v62, 0.0 }
 0x16b   :  { %v742_v8 = vmax.f32 %v741_v5, %v561_v6 }
 0x16c   :  { %v408_v9 = vpop.f32.mrb[72].mxu0 }
 0x16d   :  { %v409_v10 = vadd.f32 %v2698_v26, %v408_v9  ;;  %v1958_v11 = vpop.f32.mrb[73].mxu0 }
 0x16e   :  { %v411_v13 = vpop.f32.mrb[74].mxu0 }
 0x16f   :  { %v562_v14 = vmax.f32 %v409_v10, 0.0  ;;  %v412_v15 = vadd.f32 %v2698_v26, %v411_v13  ;;  %v1959_v16 = vpop.f32.mrb[75].mxu0 }
 0x171   :  { %v743_v17 = vmax.f32 %v742_v8, %v562_v14  ;;  %v563_v19 = vmax.f32 %v412_v15, 0.0 }
 0x173   :  { %v744_v20 = vmax.f32 %v743_v17, %v563_v19 }
 0x174   :  { %v416_v21 = vpop.f32.mrb[76].mxu0 }
 0x175   :  { %v417_v22 = vadd.f32 %v2698_v26, %v416_v21  ;;  %v1962_v23 = vpop.f32.mrb[77].mxu0 }
 0x176   :  { %v419_v24 = vpop.f32.mrb[78].mxu0 }
 0x177   :  { %v564_v25 = vmax.f32 %v417_v22, 0.0  ;;  %v420_v28 = vadd.f32 %v2698_v26, %v419_v24  ;;  %v1963_v29 = vpop.f32.mrb[79].mxu0 }
 0x179   :  { %v745_v30 = vmax.f32 %v744_v20, %v564_v25  ;;  %v565_v31 = vmax.f32 %v420_v28, 0.0 }
 0x17b   :  { %v2869_v32 = vmax.f32 %v745_v30, %v565_v31 }
 0x17c   :  { %v424_v33 = vpop.f32.mrb[80].mxu0 }
 0x17d   :  { %v425_v34 = vadd.f32 %v2698_v26, %v424_v33  ;;  %v1966_v35 = vpop.f32.mrb[81].mxu0 }
 0x17e   :  { %v427_v37 = vpop.f32.mrb[82].mxu0 }
 0x17f   :  { %v566_v38 = vmax.f32 %v425_v34, 0.0  ;;  %v428_v39 = vadd.f32 %v2698_v26, %v427_v37  ;;  %v1967_v40 = vpop.f32.mrb[83].mxu0 }
 0x181   :  { %v664_v41 = vsel %vm600_vm4, 0.0, %v566_v38  ;;  %v567_v42 = vmax.f32 %v428_v39, 0.0 }
 0x183   :  { %v753_v44 = vmax.f32 %v664_v41, %v567_v42 }
 0x184   :  { %v432_v45 = vpop.f32.mrb[84].mxu0 }
 0x185   :  { %v433_v46 = vadd.f32 %v2698_v26, %v432_v45  ;;  %v1970_v47 = vpop.f32.mrb[85].mxu0 }
 0x186   :  { %v435_v48 = vpop.f32.mrb[86].mxu0 }
 0x187   :  { %v568_v49 = vmax.f32 %v433_v46, 0.0  ;;  %v436_v50 = vadd.f32 %v2698_v26, %v435_v48  ;;  %v1971_v51 = vpop.f32.mrb[87].mxu0 }
 0x189   :  { %v754_v52 = vmax.f32 %v753_v44, %v568_v49  ;;  %v569_v53 = vmax.f32 %v436_v50, 0.0 }
 0x18b   :  { %v755_v54 = vmax.f32 %v754_v52, %v569_v53 }
 0x18c   :  { %v440_v55 = vpop.f32.mrb[88].mxu0 }
 0x18d   :  { %v441_v56 = vadd.f32 %v2698_v26, %v440_v55  ;;  %v1974_v57 = vpop.f32.mrb[89].mxu0 }
 0x18e   :  { %v443_v58 = vpop.f32.mrb[90].mxu0 }
 0x18f   :  { %v570_v59 = vmax.f32 %v441_v56, 0.0  ;;  %v444_v60 = vadd.f32 %v2698_v26, %v443_v58  ;;  %v1975_v61 = vpop.f32.mrb[91].mxu0 }
 0x191   :  { %v756_v62 = vmax.f32 %v755_v54, %v570_v59  ;;  %v571_v1 = vmax.f32 %v444_v60, 0.0 }
 0x193   :  { %v757_v2 = vmax.f32 %v756_v62, %v571_v1 }
 0x194   :  { %v448_v3 = vpop.f32.mrb[92].mxu0 }
 0x195   :  { %v449_v4 = vadd.f32 %v2698_v26, %v448_v3  ;;  %v1978_v5 = vpop.f32.mrb[93].mxu0 }
 0x196   :  { %v451_v6 = vpop.f32.mrb[94].mxu0 }
 0x197   :  { %v572_v7 = vmax.f32 %v449_v4, 0.0  ;;  %v452_v8 = vadd.f32 %v2698_v26, %v451_v6  ;;  %v1979_v9 = vpop.f32.mrb[95].mxu0 }
 0x199   :  { %v758_v10 = vmax.f32 %v757_v2, %v572_v7  ;;  %v573_v11 = vmax.f32 %v452_v8, 0.0 }
 0x19b   :  { %v2881_v13 = vmax.f32 %v758_v10, %v573_v11 }
 0x19c   :  { %v456_v14 = vpop.f32.mrb[96].mxu0 }
 0x19d   :  { %v457_v15 = vadd.f32 %v2698_v26, %v456_v14  ;;  %v1982_v16 = vpop.f32.mrb[97].mxu0 }
 0x19e   :  { %v459_v17 = vpop.f32.mrb[98].mxu0 }
 0x19f   :  { %v574_v19 = vmax.f32 %v457_v15, 0.0  ;;  %v460_v20 = vadd.f32 %v2698_v26, %v459_v17  ;;  %v1983_v21 = vpop.f32.mrb[99].mxu0 }
 0x1a0   :  { %v708_v21 = vrot.slane %v2776_v63, 4 }
 0x1a1   :  { %v672_v22 = vsel %vm600_vm4, 0.0, %v574_v19  ;;  %v575_v23 = vmax.f32 %v460_v20, 0.0  ;;  %v695_v20 = vrot.slane %v2757_v18, 4 }
 0x1a3   :  { %v766_v24 = vmax.f32 %v672_v22, %v575_v23  ;;  %v734_v23 = vrot.slane %v2828_v36, 4 }
 0x1a4   :  { %v464_v25 = vpop.f32.mrb[100].mxu0 }
 0x1a5   :  { %v465_v28 = vadd.f32 %v2698_v26, %v464_v25  ;;  %v1986_v29 = vpop.f32.mrb[101].mxu0  ;;  %v760_v25 = vrot.slane %v2881_v13, 4 }
 0x1a6   :  { %v467_v30 = vpop.f32.mrb[102].mxu0 }
 0x1a7   :  { %v576_v31 = vmax.f32 %v465_v28, 0.0  ;;  %v468_v33 = vadd.f32 %v2698_v26, %v467_v30  ;;  %v1987_v34 = vpop.f32.mrb[103].mxu0 }
 0x1a9   :  { %v767_v35 = vmax.f32 %v766_v24, %v576_v31  ;;  %v577_v37 = vmax.f32 %v468_v33, 0.0  ;;  %v747_v24 = vrot.slane %v2869_v32, 4  ;;  %v696_v31 = vmax.f32 %v2757_v18, %v695_v20 }
 0x1ab   :  { %v768_v38 = vmax.f32 %v767_v35, %v577_v37  ;;  %v709_v35 = vmax.f32 %v2776_v63, %v708_v21  ;;  %v722_v37 = vmax.f32 %v2788_v43, %v721_v27 }
 0x1ac   :  { %v472_v39 = vpop.f32.mrb[104].mxu0 }
 0x1ad   :  { %v473_v40 = vadd.f32 %v2698_v26, %v472_v39  ;;  %v1990_v41 = vpop.f32.mrb[105].mxu0 }
 0x1ae   :  { %v475_v42 = vpop.f32.mrb[106].mxu0  ;;  %v735_v41 = vmax.f32 %v2828_v36, %v734_v23 }
 0x1af   :  { %v578_v44 = vmax.f32 %v473_v40, 0.0  ;;  %v476_v45 = vadd.f32 %v2698_v26, %v475_v42  ;;  %v1991_v46 = vpop.f32.mrb[107].mxu0  ;;  %v748_v42 = vmax.f32 %v2869_v32, %v747_v24 }
 0x1b0   :  { %v736_v63 = vrot.slane %v735_v41, 2 }
 0x1b1   :  { %v769_v47 = vmax.f32 %v768_v38, %v578_v44  ;;  %v579_v48 = vmax.f32 %v476_v45, 0.0  ;;  %v761_v44 = vmax.f32 %v2881_v13, %v760_v25 }
 0x1b3   :  { %v770_v49 = vmax.f32 %v769_v47, %v579_v48  ;;  %v697_v47 = vrot.slane %v696_v31, 2  ;;  %v710_v48 = vrot.slane %v709_v35, 2  ;;  %v762_v43 = vrot.slane %v761_v44, 2 }
 0x1b4   :  { %v480_v50 = vpop.f32.mrb[108].mxu0 }
 0x1b5   :  { %v481_v51 = vadd.f32 %v2698_v26, %v480_v50  ;;  %v1994_v52 = vpop.f32.mrb[109].mxu0  ;;  %v711_v32 = vmax.f32 %v709_v35, %v710_v48 }
 0x1b6   :  { %v483_v53 = vpop.f32.mrb[110].mxu0 }
 0x1b7   :  { %v580_v54 = vmax.f32 %v481_v51, 0.0  ;;  %v484_v55 = vadd.f32 %v2698_v26, %v483_v53  ;;  %v1995_v56 = vpop.f32.mrb[111].mxu0  ;;  %v749_v51 = vrot.slane %v748_v42, 2 }
 0x1b9   :  { %v771_v57 = vmax.f32 %v770_v49, %v580_v54  ;;  %v581_v58 = vmax.f32 %v484_v55, 0.0  ;;  %v723_v49 = vrot.slane %v722_v37, 2  ;;  %v698_v55 = vmax.f32 %v696_v31, %v697_v47 }
 0x1bb   :  { %v772_v59 = vmax.f32 %v771_v57, %v581_v58  ;;  %v724_v57 = vmax.f32 %v722_v37, %v723_v49 }
 0x1bc   :  { %v488_v60 = vpop.f32.mrb[112].mxu0 }
 0x1bd   :  { %v489_v61 = vadd.f32 %v2698_v26, %v488_v60  ;;  %v1998_v62 = vpop.f32.mrb[113].mxu0  ;;  %v773_v33 = vrot.slane %v772_v59, 4 }
 0x1be   :  { %v491_v1 = vpop.f32.mrb[114].mxu0  ;;  %v763_v62 = vmax.f32 %v761_v44, %v762_v43 }
 0x1bf   :  { %v582_v2 = vmax.f32 %v489_v61, 0.0  ;;  %v492_v3 = vadd.f32 %v2698_v26, %v491_v1  ;;  %v1999_v4 = vpop.f32.mrb[115].mxu0  ;;  %v774_v18 = vmax.f32 %v772_v59, %v773_v33  ;;  %v737_v59 = vmax.f32 %v735_v41, %v736_v63 }
 0x1c0   :  { %v750_v61 = vmax.f32 %v748_v42, %v749_v51 }
 0x1c1   :  { %v680_v5 = vsel %vm600_vm4, 0.0, %v582_v2  ;;  %v583_v6 = vmax.f32 %v492_v3, 0.0  ;;  %v775_v36 = vrot.slane %v774_v18, 2  ;;  %v699_v3 = vrot.slane %v698_v55, 1 }
 0x1c3   :  { %v779_v7 = vmax.f32 %v680_v5, %v583_v6  ;;  %v776_v4 = vmax.f32 %v774_v18, %v775_v36  ;;  %v712_v5 = vrot.slane %v711_v32, 1  ;;  %v725_v6 = vrot.slane %v724_v57, 1 }
 0x1c4   :  { %v496_v8 = vpop.f32.mrb[116].mxu0 }
 0x1c5   :  { %v497_v9 = vadd.f32 %v2698_v26, %v496_v8  ;;  %v2002_v10 = vpop.f32.mrb[117].mxu0  ;;  %v738_v8 = vrot.slane %v737_v59, 1  ;;  %v713_v21 = vmax.f32 %v711_v32, %v712_v5  ;;  %v726_v27 = vmax.f32 %v724_v57, %v725_v6  ;;  %v940_v57 = vld [vmem:[%s3410_s2 + $0x18] sm:$0xff]  ;;  %v1057_v5 = vld [vmem:[%s3412_s3 + $0x100] sm:$0xff]  ;;  %v1059_v6 = vld [vmem:[%s3412_s3 + $0x110] sm:$0xff] }
 0x1c6   :  { %v499_v11 = vpop.f32.mrb[118].mxu0  ;;  %v764_v10 = vrot.slane %v763_v62, 1 }
 0x1c7   :  { %v584_v14 = vmax.f32 %v497_v9, 0.0  ;;  %v500_v15 = vadd.f32 %v2698_v26, %v499_v11  ;;  %v2003_v16 = vpop.f32.mrb[119].mxu0  ;;  %v751_v9 = vrot.slane %v750_v61, 1  ;;  %v739_v25 = vmax.f32 %v737_v59, %v738_v8  ;;  %v1058_v59 = vld [vmem:[%s3412_s3 + $0x108] sm:$0xff]  ;;  %v1064_v8 = vld [vmem:[%s3412_s3 + $0x138] sm:$0xff] }
 0x1c9   :  { %v780_v17 = vmax.f32 %v779_v7, %v584_v14  ;;  %v585_v19 = vmax.f32 %v500_v15, 0.0 }
 0x1cb   :  { %v781_v22 = vmax.f32 %v780_v17, %v585_v19  ;;  %v700_v17 = vmax.f32 %v698_v55, %v699_v3  ;;  %v777_v19 = vrot.slane %v776_v4, 1 }
 0x1cc   :  { %v504_v28 = vpop.f32.mrb[120].mxu0 }
 0x1cd   :  { %v505_v29 = vadd.f32 %v2698_v26, %v504_v28  ;;  %v2006_v30 = vpop.f32.mrb[121].mxu0  ;;  %v752_v28 = vmax.f32 %v750_v61, %v751_v9  ;;  %v778_v35 = vmax.f32 %v776_v4, %v777_v19  ;;  %v1060_v61 = vld [vmem:[%s3412_s3 + $0x118] sm:$0xff]  ;;  %v2946_v9 = vld [vmem:[%s3413_s1] sm:$0xff] }
 0x1ce   :  { %v507_v34 = vpop.f32.mrb[122].mxu0  ;;  %v2237_v4 = vpack.c.bf16 %v1060_v61, %v1058_v59  ;;  %v1032_v59 = vld [vmem:[%s3412_s3 + $0x38] sm:$0xff]  ;;  %1525 = vrot.lane.b32.xlu0 %v2946_v9, %s2419_s7 }
 0x1cf   :  { %v586_v38 = vmax.f32 %v505_v29, 0.0  ;;  %v508_v39 = vadd.f32 %v2698_v26, %v507_v34  ;;  %v2007_v40 = vpop.f32.mrb[123].mxu0  ;;  %v765_v29 = vmax.f32 %v763_v62, %v764_v10  ;;  %v2239_v10 = vpack.c.bf16 %v1059_v6, %v1057_v5  ;;  %v1031_v5 = vld [vmem:[%s3412_s3 + $0x30] sm:$0xff]  ;;  %v1034_v6 = vld [vmem:[%s3412_s3 + $0x48] sm:$0xff] }
 0x1d1   :  { %v782_v45 = vmax.f32 %v781_v22, %v586_v38  ;;  %v587_v46 = vmax.f32 %v508_v39, 0.0 }
 0x1d3   :  { %v783_v50 = vmax.f32 %v782_v45, %v587_v46 }
 0x1d4   :  { %v512_v52 = vpop.f32.mrb[124].mxu0 }
 0x1d5   :  { %v513_v53 = vadd.f32 %v2698_v26, %v512_v52  ;;  %v2010_v54 = vpop.f32.mrb[125].mxu0 }
 0x1d6   :  { %v515_v56 = vpop.f32.mrb[126].mxu0 }
 0x1d7   :  { %v588_v13 = vmax.f32 %v513_v53, 0.0  ;;  %v516_v58 = vadd.f32 %v2698_v26, %v515_v56  ;;  %v2011_v60 = vpop.f32.mrb[127].mxu0 }
 0x1d9   :  { %v784_v1 = vmax.f32 %v783_v50, %v588_v13  ;;  %v589_v2 = vmax.f32 %v516_v58, 0.0  ;;  %v941_v13 = vld [vmem:[%s3410_s2 + $0x20] sm:$0xf] }
 0x1db   :  { %v785_v7 = vmax.f32 %v784_v1, %v589_v2  ;;  %v2234_v2 = vpack.c.bf16 %v941_v13, %v940_v57  ;;  %v1025_v57 = vld [vmem:[%s3412_s3] sm:$0xff]  ;;  %v1027_v13 = vld [vmem:[%s3412_s3 + $0x10] sm:$0xff] }
 0x1dc   :  { %v520_v11 = vpop.f32.mrb[128].mxu0 }
 0x1dd   :  { %v786_v14 = vrot.slane %v785_v7, 4  ;;  %v521_v15 = vadd.f32 %v2698_v26, %v520_v11  ;;  %v2014_v16 = vpop.f32.mrb[129].mxu0 }
 0x1de   :  { %v523_v20 = vpop.f32.mrb[130].mxu0  ;;  %v1066_v16 = vld [vmem:[%s3412_s3 + $0x148] sm:$0xff] }
 0x1df   :  { %v787_v22 = vmax.f32 %v785_v7, %v786_v14  ;;  %v590_v23 = vmax.f32 %v521_v15, 0.0  ;;  %v2015_v24 = vpop.f32.mrb[131].mxu0  ;;  %v1062_v7 = vld [vmem:[%s3412_s3 + $0x128] sm:$0xff]  ;;  %v1061_v14 = vld [vmem:[%s3412_s3 + $0x120] sm:$0xff]  ;;  %v1063_v15 = vld [vmem:[%s3412_s3 + $0x130] sm:$0xff] }
 0x1e0   :  { %v2241_v11 = vpack.c.bf16 %v1064_v8, %v1062_v7  ;;  %v2243_v19 = vpack.c.bf16 %v1063_v15, %v1061_v14  ;;  %v1036_v7 = vld [vmem:[%s3412_s3 + $0x58] sm:$0xff]  ;;  %v1035_v14 = vld [vmem:[%s3412_s3 + $0x50] sm:$0xff]  ;;  %v1038_v15 = vld [vmem:[%s3412_s3 + $0x68] sm:$0xff] }
 0x1e1   :  { %v788_v30 = vrot.slane %v787_v22, 2  ;;  %v793_v31 = vrot.slane %v590_v23, 1  ;;  %v794_v33 = vrot.slane %v590_v23, 2  ;;  %v795_v34 = vrot.slane %v590_v23, 3 }
 0x1e2   :  { %v796_v37 = vrot.slane %v590_v23, 4  ;;  %v797_v26 = vrot.slane %v590_v23, 5  ;;  %v798_v38 = vrot.slane %v590_v23, 6  ;;  %v808_v40 = vmax.f32 %v700_v17, %v590_v23  ;;  %v1068_v17 = vld [vmem:[%s3412_s3 + $0x158] sm:$0xff] }
 0x1e3   :  { %v789_v39 = vmax.f32 %v787_v22, %v788_v30  ;;  %v809_v41 = vmax.f32 %v713_v21, %v793_v31  ;;  %v810_v42 = vmax.f32 %v726_v27, %v794_v33  ;;  %v811_v44 = vmax.f32 %v739_v25, %v795_v34  ;;  %v1065_v21 = vld [vmem:[%s3412_s3 + $0x140] sm:$0xff]  ;;  %v1067_v27 = vld [vmem:[%s3412_s3 + $0x150] sm:$0xff]  ;;  %v1070_v22 = vld [vmem:[%s3412_s3 + $0x168] sm:$0xff] }
 0x1e4   :  { %v812_v45 = vmax.f32 %v752_v28, %v796_v37  ;;  %v813_v46 = vmax.f32 %v765_v29, %v797_v26  ;;  %v814_v47 = vmax.f32 %v778_v35, %v798_v38  ;;  %v799_v63 = vrot.slane %v590_v23, 7  ;;  %v1069_v28 = vld [vmem:[%s3412_s3 + $0x160] sm:$0xff]  ;;  %v1071_v29 = vld [vmem:[%s3412_s3 + $0x170] sm:$0xff]  ;;  %v1074_v30 = vld [vmem:[%s3412_s3 + $0x188] sm:$0xff] }
 0x1e5   :  { %v790_v18 = vrot.slane %v789_v39, 1  ;;  %v824_v48 = vrot.slane %v809_v41, 7  ;;  %v827_v49 = vrot.slane %v810_v42, 6  ;;  %v830_v43 = vrot.slane %v811_v44, 5  ;;  %v1076_v31 = vld [vmem:[%s3412_s3 + $0x198] sm:$0xff]  ;;  %v1073_v35 = vld [vmem:[%s3412_s3 + $0x180] sm:$0xff] }
 0x1e6   :  { %v833_v53 = vrot.slane %v812_v45, 4  ;;  %v836_v36 = vrot.slane %v813_v46, 3  ;;  %v839_v32 = vrot.slane %v814_v47, 2  ;;  %v2245_v20 = vpack.c.bf16 %v1068_v17, %v1066_v16  ;;  %v1075_v37 = vld [vmem:[%s3412_s3 + $0x190] sm:$0xff]  ;;  %v1078_v26 = vld [vmem:[%s3412_s3 + $0x1a8] sm:$0xff]  ;;  %v1080_v38 = vld [vmem:[%s3412_s3 + $0x1b8] sm:$0xff] }
 0x1e7   :  { %v791_v50 = vmax.f32 %v789_v39, %v790_v18  ;;  %v826_v51 = vsel %vm825_vm5, %v824_v48, %v808_v40  ;;  %v2247_v24 = vpack.c.bf16 %v1067_v27, %v1065_v21  ;;  %v2251_v33 = vpack.c.bf16 %v1071_v29, %v1069_v28  ;;  %v1077_v41 = vld [vmem:[%s3412_s3 + $0x1a0] sm:$0xff]  ;;  %v1079_v42 = vld [vmem:[%s3412_s3 + $0x1b0] sm:$0xff]  ;;  %v1082_v44 = vld [vmem:[%s3412_s3 + $0x1c8] sm:$0xff] }
 0x1e8   :  { %v829_v52 = vsel %vm828_vm6, %v827_v49, %v826_v51  ;;  %v2253_v34 = vpack.c.bf16 %v1076_v31, %v1074_v30  ;;  %v2255_v39 = vpack.c.bf16 %v1075_v37, %v1073_v35  ;;  %v2257_v40 = vpack.c.bf16 %v1080_v38, %v1078_v26  ;;  %v1084_v45 = vld [vmem:[%s3412_s3 + $0x1d8] sm:$0xff]  ;;  %v1081_v18 = vld [vmem:[%s3412_s3 + $0x1c0] sm:$0xff]  ;;  %v1083_v48 = vld [vmem:[%s3412_s3 + $0x1d0] sm:$0xff] }
 0x1e9   :  { %v815_v54 = vmax.f32 %v791_v50, %v799_v63  ;;  %v832_v55 = vsel %vm831_vm7, %v830_v43, %v829_v52  ;;  %v2259_v46 = vpack.c.bf16 %v1079_v42, %v1077_v41  ;;  %v2261_v47 = vpack.c.bf16 %v1084_v45, %v1082_v44  ;;  %v1086_v50 = vld [vmem:[%s3412_s3 + $0x1e8] sm:$0xff]  ;;  %v1088_v63 = vld [vmem:[%s3412_s3 + $0x1f8] sm:$0xff]  ;;  %v1085_v43 = vld [vmem:[%s3412_s3 + $0x1e0] sm:$0xff] }
 0x1ea   :  { %v835_v56 = vsel %vm834_vm8, %v833_v53, %v832_v55  ;;  %v2263_v49 = vpack.c.bf16 %v1083_v48, %v1081_v18  ;;  %v2265_v51 = vpack.c.bf16 %v1088_v63, %v1086_v50  ;;  %v1087_v52 = vld [vmem:[%s3412_s3 + $0x1f0] sm:$0xff]  ;;  %v1028_v55 = vld [vmem:[%s3412_s3 + $0x18] sm:$0xff]  ;;  %v1042_v27 = vld [vmem:[%s3412_s3 + $0x88] sm:$0xff] }
 0x1eb   :  { %v838_v58 = vsel %vm837_vm9, %v836_v36, %v835_v56  ;;  %v842_v60 = vrot.slane %v815_v54, 1  ;;  %v2267_v53 = vpack.c.bf16 %v1087_v52, %v1085_v43  ;;  %v1026_v54 = vld [vmem:[%s3412_s3 + $0x8] sm:$0xff]  ;;  %v1040_v16 = vld [vmem:[%s3412_s3 + $0x78] sm:$0xff]  ;;  %v1039_v21 = vld [vmem:[%s3412_s3 + $0x70] sm:$0xff] }
 0x1ec   :  { %v841_v62 = vsel %vm840_vm10, %v839_v32, %v838_v58  ;;  %v2269_v36 = vpack.c.bf16 %v1028_v55, %v1026_v54  ;;  %v1745_v58 = vld [vmem:[%s3410_s2 + $0x8] ss:$0 sm:$0xff]  ;;  %v1043_v28 = vld [vmem:[%s3412_s3 + $0x90] sm:$0xff]  ;;  %v1048_v30 = vld [vmem:[%s3412_s3 + $0xb8] sm:$0xff] }
 0x1ed   :  { %v844_v1 = vsel %vm843_vm11, %v842_v60, %v841_v62  ;;  %v1030_v60 = vld [vmem:[%s3412_s3 + $0x28] sm:$0xff]  ;;  %v2271_v62 = vpack.c.bf16 %v1027_v13, %v1025_v57  ;;  %v1047_v35 = vld [vmem:[%s3412_s3 + $0xb0] sm:$0xff]  ;;  %v1052_v26 = vld [vmem:[%s3412_s3 + $0xd8] sm:$0xff] }
 0x1ee   :  { %v846_v3 = vadd.f32 %v844_v1, %v590_v23  ;;  %v1072_v23 = vld [vmem:[%s3412_s3 + $0x178] sm:$0xff]  ;;  %v1046_v29 = vld [vmem:[%s3412_s3 + $0xa8] sm:$0xff]  ;;  %v1051_v41 = vld [vmem:[%s3412_s3 + $0xd0] sm:$0xff] }
 0x1ef   :  { %v2249_v25 = vpack.c.bf16 %v1072_v23, %v1070_v22  ;;  %v1044_v22 = vld [vmem:[%s3412_s3 + $0x98] sm:$0xff]  ;;  %v1050_v37 = vld [vmem:[%s3412_s3 + $0xc8] sm:$0xff]  ;;  %v1055_v18 = vld [vmem:[%s3412_s3 + $0xf0] sm:$0xff] }
 0x1f0   :  { %2049 = vmatmul.mubr.f32.vlgmr.msra.gmra.mrb[0].mxu1 %v846_v3  ;;  %v2273_v3 = vpack.c.bf16 %v1032_v59, %v1030_v60  ;;  %v1054_v42 = vld [vmem:[%s3412_s3 + $0xe8] sm:$0xff]  ;;  %v1056_v44 = vld [vmem:[%s3412_s3 + $0xf8] sm:$0xff]  ;;  %v1744_v48 = vld [vmem:[%s3410_s2 + $0x5] ss:$0 sm:$0xff] }
 0x1f1   :  { %2236 = vmatpush3.bf16.msk.msra.mxu1 %vm2235_vm14, %v2234_v2  ;;  %2055 = vmatprep.mubr.msk.f32.mxu1 %vm2416_vm2, %v2414_v0  ;;  %v1246_v63 = vld [vmem:[%s3410_s2 + $0xa8] sm:$0xff]  ;;  %v1249_v54 = vld [vmem:[%s3410_s2 + $0xc0] sm:$0xff]  ;;  %v1252_v57 = vld [vmem:[%s3410_s2 + $0xd8] sm:$0xff] }
 0x1f2   :  { %2238 = vmatprep.subr.bf16.mxu1 %v2237_v4  ;;  %v1029_v4 = vld [vmem:[%s3412_s3 + $0x20] sm:$0xff]  ;;  %v1254_v60 = vld [vmem:[%s3410_s2 + $0xe8] sm:$0xff]  ;;  %v1255_v59 = vld [vmem:[%s3410_s2 + $0xf0] sm:$0xff] }
 0x1f3   :  { %v2275_v8 = vpack.c.bf16 %v1031_v5, %v1029_v4  ;;  %v1253_v13 = vld [vmem:[%s3410_s2 + $0xe0] sm:$0xff]  ;;  %v1259_v4 = vld [vmem:[%s3410_s2 + $0x110] sm:$0xff] }
 0x1f4   :  { %2056 = vmatmul.mubr.msk.f32.vlgmr.msra.gmra.mrb[2].mxu1 %vm947_vm15, %v2946_v9  ;;  %v1536_v9 = vld [vmem:[%s3410_s2 + $0x238] sm:$0xff] }
 0x1f5   :  { %2240 = vmatpush1.bf16.msra.mxu1 %v2239_v10  ;;  %1153 = vmatprep.mubr.f32.mxu1 %v2414_v0  ;;  %v2277_v10 = vpack.c.bf16 %v1036_v7, %v1034_v6  ;;  %v1260_v6 = vld [vmem:[%s3410_s2 + $0x118] sm:$0xff]  ;;  %v1261_v7 = vld [vmem:[%s3410_s2 + $0x120] sm:$0xff] }
 0x1f6   :  { %2242 = vmatprep.subr.bf16.mxu1 %v2241_v11  ;;  %v1033_v11 = vld [vmem:[%s3412_s3 + $0x40] sm:$0xff] }
 0x1f7   :  { %v2279_v17 = vpack.c.bf16 %v1035_v14, %v1033_v11  ;;  %v1340_v14 = vld [vmem:[%s3410_s2 + $0x128] sm:$0xff] }
 0x1f9   :  { %2244 = vmatpush1.bf16.msra.mxu1 %v2243_v19  ;;  %v2281_v19 = vpack.c.bf16 %v1040_v16, %v1038_v15  ;;  %v1341_v15 = vld [vmem:[%s3410_s2 + $0x130] sm:$0xff] }
 0x1fa   :  { %2246 = vmatprep.subr.bf16.mxu1 %v2245_v20  ;;  %v1037_v20 = vld [vmem:[%s3412_s3 + $0x60] sm:$0xff] }
 0x1fb   :  { %v2283_v23 = vpack.c.bf16 %v1039_v21, %v1037_v20  ;;  %v2326_v20 = vpack.c.bf16 %v1341_v15, %v1340_v14  ;;  %v1342_v21 = vld [vmem:[%s3410_s2 + $0x138] sm:$0xff]  ;;  %v1534_v15 = vld [vmem:[%s3410_s2 + $0x228] sm:$0xff] }
 0x1fd   :  { %2248 = vmatpush1.bf16.msra.mxu1 %v2247_v24  ;;  %v2285_v24 = vpack.c.bf16 %v1044_v22, %v1042_v27  ;;  %v1343_v27 = vld [vmem:[%s3410_s2 + $0x140] sm:$0xff] }
 0x1fe   :  { %2250 = vmatprep.subr.bf16.mxu1 %v2249_v25  ;;  %v1041_v25 = vld [vmem:[%s3412_s3 + $0x80] sm:$0xff] }
 0x1ff   :  { %v2287_v31 = vpack.c.bf16 %v1043_v28, %v1041_v25  ;;  %v1345_v25 = vld [vmem:[%s3410_s2 + $0x150] sm:$0xff] }
 0x201   :  { %2252 = vmatpush1.bf16.msra.mxu1 %v2251_v33  ;;  %v2289_v33 = vpack.c.bf16 %v1048_v30, %v1046_v29  ;;  %v1346_v29 = vld [vmem:[%s3410_s2 + $0x158] sm:$0xff]  ;;  %v1347_v30 = vld [vmem:[%s3410_s2 + $0x160] sm:$0xff] }
 0x202   :  { %2254 = vmatprep.subr.bf16.mxu1 %v2253_v34  ;;  %v1045_v34 = vld [vmem:[%s3412_s3 + $0xa0] sm:$0xff] }
 0x203   :  { %v2291_v38 = vpack.c.bf16 %v1047_v35, %v1045_v34  ;;  %v1349_v34 = vld [vmem:[%s3410_s2 + $0x170] sm:$0xff] }
 0x205   :  { %2256 = vmatpush1.bf16.msra.mxu1 %v2255_v39  ;;  %v2293_v39 = vpack.c.bf16 %v1052_v26, %v1050_v37  ;;  %v1350_v37 = vld [vmem:[%s3410_s2 + $0x178] sm:$0xff]  ;;  %v1351_v26 = vld [vmem:[%s3410_s2 + $0x180] sm:$0xff] }
 0x206   :  { %2258 = vmatprep.subr.bf16.mxu1 %v2257_v40  ;;  %v1049_v40 = vld [vmem:[%s3412_s3 + $0xc0] sm:$0xff] }
 0x207   :  { %v2295_v45 = vpack.c.bf16 %v1051_v41, %v1049_v40  ;;  %v1353_v40 = vld [vmem:[%s3410_s2 + $0x190] sm:$0xff] }
 0x209   :  { %2260 = vmatpush1.bf16.msra.mxu1 %v2259_v46  ;;  %v2297_v46 = vpack.c.bf16 %v1056_v44, %v1054_v42  ;;  %v1354_v42 = vld [vmem:[%s3410_s2 + $0x198] sm:$0xff]  ;;  %v1355_v44 = vld [vmem:[%s3410_s2 + $0x1a0] sm:$0xff] }
 0x20a   :  { %2262 = vmatprep.subr.bf16.mxu1 %v2261_v47  ;;  %v1053_v47 = vld [vmem:[%s3412_s3 + $0xe0] sm:$0xff] }
 0x20d   :  { %2264 = vmatpush1.bf16.msra.mxu1 %v2263_v49  ;;  %v2299_v49 = vpack.c.bf16 %v1055_v18, %v1053_v47  ;;  %v1431_v18 = vld [vmem:[%s3410_s2 + $0x1a8] sm:$0xff] }
 0x20e   :  { %2266 = vmatprep.subr.bf16.mxu1 %v2265_v51  ;;  %v1247_v51 = vld [vmem:[%s3410_s2 + $0xb0] sm:$0xff] }
 0x20f   :  { %v2302_v43 = vpack.c.bf16 %v1247_v51, %v1246_v63 }
 0x211   :  { %2268 = vmatpush1.bf16.msra.mxu1 %v2267_v53  ;;  %v1248_v53 = vld [vmem:[%s3410_s2 + $0xb8] sm:$0xff] }
 0x212   :  { %2270 = vmatprep.subr.bf16.mxu1 %v2269_v36  ;;  %v2305_v55 = vpack.c.bf16 %v1249_v54, %v1248_v53  ;;  %v1250_v36 = vld [vmem:[%s3410_s2 + $0xc8] sm:$0xff] }
 0x2c3   :  { %v3034_v56 = vpop.f32.mrb[0].mxu1 }
 0x2c4   :  { %v2050_v32 = vpop.f32.mrb[1].mxu1  ;;  %v935_v50 = vadd.f32 %v1744_v48, %v3034_v56  ;;  %v1251_v56 = vld [vmem:[%s3410_s2 + $0xd0] sm:$0xff] }
 0x2c5   :  { %v2308_v32 = vpack.c.bf16 %v1251_v56, %v1250_v36  ;;  %v1432_v48 = vld [vmem:[%s3410_s2 + $0x1b0] sm:$0xff] }
 0x2c6   :  { %v938_v52 = vmax.f32 %v935_v50, 0.0  ;;  %v2350_v51 = vpack.c.bf16 %v1432_v48, %v1431_v18  ;;  %v1436_v36 = vld [vmem:[%s3410_s2 + $0x1d0] sm:$0xff] }
 0x2c7   :  { %v1021_v61 = vpop.f32.mrb[2].mxu1  ;;  %v1622_v18 = vld [vmem:[%s3410_s2 + $0x2f0] sm:$0xff] }
 0x2c8   :  { %v1022_v1 = vadd.f32 %v1745_v58, %v1021_v61  ;;  %v2057_v2 = vpop.f32.mrb[3].mxu1  ;;  %v2311_v58 = vpack.c.bf16 %v1253_v13, %v1252_v57  ;;  %v2314_v61 = vpack.c.bf16 %v1255_v59, %v1254_v60  ;;  %v1438_v57 = vld [vmem:[%s3410_s2 + $0x1e0] sm:$0xff]  ;;  %v1440_v60 = vld [vmem:[%s3410_s2 + $0x1f0] sm:$0xff] }
 0x2ca   :  { %1154 = vmatmul.mubr.f32.vlgmr.msra.gmra.mrb[4].mxu1 %v1022_v1  ;;  %v1257_v1 = vld [vmem:[%s3410_s2 + $0x100] sm:$0xff] }
 0x2cb   :  { %2272 = vmatpush1.bf16.msra.mxu1 %v2271_v62  ;;  %1224 = vmatprep.mubr.f32.mxu1 %v2414_v0  ;;  %v1256_v62 = vld [vmem:[%s3410_s2 + $0xf8] sm:$0xff] }
 0x2cc   :  { %2274 = vmatprep.subr.bf16.mxu1 %v2273_v3  ;;  %v2317_v2 = vpack.c.bf16 %v1257_v1, %v1256_v62  ;;  %v1258_v3 = vld [vmem:[%s3410_s2 + $0x108] sm:$0xff]  ;;  %v1442_v62 = vld [vmem:[%s3410_s2 + $0x200] sm:$0xff] }
 0x2cd   :  { %v2320_v5 = vpack.c.bf16 %v1259_v4, %v1258_v3  ;;  %v1444_v3 = vld [vmem:[%s3410_s2 + $0x210] sm:$0xff] }
 0x2cf   :  { %2276 = vmatpush1.bf16.msra.mxu1 %v2275_v8  ;;  %v2323_v8 = vpack.c.bf16 %v1261_v7, %v1260_v6  ;;  %v1446_v6 = vld [vmem:[%s3410_s2 + $0x220] sm:$0xff] }
 0x2d0   :  { %2278 = vmatprep.subr.bf16.mxu1 %v2277_v10  ;;  %v1748_v10 = vld [vmem:[%s3410_s2 + $0x1] ss:$0 sm:$0xff] }
 0x2d3   :  { %2280 = vmatpush1.bf16.msra.mxu1 %v2279_v17 }
 0x2d4   :  { %2282 = vmatprep.subr.bf16.mxu1 %v2281_v19 }
 0x2d7   :  { %2284 = vmatpush1.bf16.msra.mxu1 %v2283_v23  ;;  %v2329_v23 = vpack.c.bf16 %v1343_v27, %v1342_v21  ;;  %v1752_v27 = vld [vmem:[%s3410_s2 + $0x3] ss:$0 sm:$0xff] }
 0x2d8   :  { %2286 = vmatprep.subr.bf16.mxu1 %v2285_v24  ;;  %v1344_v24 = vld [vmem:[%s3410_s2 + $0x148] sm:$0xff] }
 0x2d9   :  { %v2332_v28 = vpack.c.bf16 %v1345_v25, %v1344_v24 }
 0x2db   :  { %2288 = vmatpush1.bf16.msra.mxu1 %v2287_v31  ;;  %v2335_v31 = vpack.c.bf16 %v1347_v30, %v1346_v29  ;;  %v1526_v29 = vpop.permute.xlu0 %1525 }
 0x2dc   :  { %2290 = vmatprep.subr.bf16.mxu1 %v2289_v33  ;;  %v1348_v33 = vld [vmem:[%s3410_s2 + $0x168] sm:$0xff] }
 0x2dd   :  { %v2338_v35 = vpack.c.bf16 %v1349_v34, %v1348_v33  ;;  %v1613_v33 = vld [vmem:[%s3410_s2 + $0x2a8] sm:$0xff]  ;;  %v1614_v34 = vld [vmem:[%s3410_s2 + $0x2b0] sm:$0xff] }
 0x2df   :  { %2292 = vmatpush1.bf16.msra.mxu1 %v2291_v38  ;;  %v2341_v38 = vpack.c.bf16 %v1351_v26, %v1350_v37  ;;  %v2380_v37 = vpack.c.bf16 %v1614_v34, %v1613_v33 }
 0x2e0   :  { %2294 = vmatprep.subr.bf16.mxu1 %v2293_v39  ;;  %v1352_v39 = vld [vmem:[%s3410_s2 + $0x188] sm:$0xff] }
 0x2e1   :  { %v2344_v41 = vpack.c.bf16 %v1353_v40, %v1352_v39  ;;  %v1616_v39 = vld [vmem:[%s3410_s2 + $0x2c0] sm:$0xff] }
 0x2e3   :  { %2296 = vmatpush1.bf16.msra.mxu1 %v2295_v45  ;;  %v2347_v45 = vpack.c.bf16 %v1355_v44, %v1354_v42  ;;  %v1618_v42 = vld [vmem:[%s3410_s2 + $0x2d0] sm:$0xff] }
 0x2e4   :  { %2298 = vmatprep.subr.bf16.mxu1 %v2297_v46  ;;  %v1750_v46 = vld [vmem:[%s3410_s2 + $0x6] ss:$0 sm:$0xff] }
 0x2e7   :  { %2300 = vmatpush1.bf16.msra.mxu1 %v2299_v49 }
 0x2e8   :  { %2301 = vmatprep.subr.bf16.mxu1 %v2417_v12 }
 0x2ea   :  { %1225 = vmatmul.mubr.f32.vlgmr.msra.gmra.mrb[4].mxu1 %v938_v52  ;;  %v1434_v52 = vld [vmem:[%s3410_s2 + $0x1c0] sm:$0xff] }
 0x2eb   :  { %2303 = vmatpush3.bf16.msra.mxu1 %v2302_v43  ;;  %2090 = vmatprep.mubr.msk.f32.mxu1 %vm2416_vm2, %v2414_v0  ;;  %v1433_v43 = vld [vmem:[%s3410_s2 + $0x1b8] sm:$0xff] }
 0x2ec   :  { %2304 = vmatprep.subr.bf16.mxu1 %v2417_v12  ;;  %v2353_v54 = vpack.c.bf16 %v1434_v52, %v1433_v43  ;;  %v1626_v43 = vld [vmem:[%s3410_s2 + $0x310] sm:$0xff] }
 0x2ef   :  { %2306 = vmatpush3.bf16.msra.mxu1 %v2305_v55  ;;  %v1435_v55 = vld [vmem:[%s3410_s2 + $0x1c8] sm:$0xff] }
 0x2f0   :  { %2307 = vmatprep.subr.bf16.mxu1 %v2417_v12  ;;  %v2356_v56 = vpack.c.bf16 %v1436_v36, %v1435_v55  ;;  %v1749_v36 = vld [vmem:[%s3410_s2 + $0x2] ss:$0 sm:$0xff] }
 0x2f3   :  { %2309 = vmatpush3.bf16.msra.mxu1 %v2308_v32  ;;  %v1437_v32 = vld [vmem:[%s3410_s2 + $0x1d8] sm:$0xff] }
 0x2f4   :  { %2310 = vmatprep.subr.bf16.mxu1 %v2417_v12  ;;  %v2359_v13 = vpack.c.bf16 %v1438_v57, %v1437_v32 }
 0x2f7   :  { %2312 = vmatpush3.bf16.msra.mxu1 %v2311_v58  ;;  %v1439_v58 = vld [vmem:[%s3410_s2 + $0x1e8] sm:$0xff] }
 0x2f8   :  { %2313 = vmatprep.subr.bf16.mxu1 %v2417_v12  ;;  %v2362_v59 = vpack.c.bf16 %v1440_v60, %v1439_v58 }
 0x2fb   :  { %2315 = vmatpush3.bf16.msra.mxu1 %v2314_v61  ;;  %v1441_v61 = vld [vmem:[%s3410_s2 + $0x1f8] sm:$0xff] }
 0x2fc   :  { %2316 = vmatprep.subr.bf16.mxu1 %v2417_v12  ;;  %v2365_v1 = vpack.c.bf16 %v1442_v62, %v1441_v61 }
 0x2ff   :  { %2318 = vmatpush3.bf16.msra.mxu1 %v2317_v2  ;;  %v1443_v2 = vld [vmem:[%s3410_s2 + $0x208] sm:$0xff] }
 0x300   :  { %2319 = vmatprep.subr.bf16.mxu1 %v2417_v12  ;;  %v2368_v4 = vpack.c.bf16 %v1444_v3, %v1443_v2 }
 0x303   :  { %2321 = vmatpush3.bf16.msra.mxu1 %v2320_v5  ;;  %v1445_v5 = vld [vmem:[%s3410_s2 + $0x218] sm:$0xff] }
 0x304   :  { %2322 = vmatprep.subr.bf16.mxu1 %v2417_v12  ;;  %v2371_v7 = vpack.c.bf16 %v1446_v6, %v1445_v5 }
 0x307   :  { %2324 = vmatpush3.bf16.msra.mxu1 %v2323_v8  ;;  %v1751_v8 = vld [vmem:[%s3410_s2 + $0x7] ss:$0 sm:$0xff] }
 0x308   :  { %2325 = vmatprep.subr.bf16.mxu1 %v2417_v12 }
 0x3bd   :  { %v1226_v11 = vpop.f32.mrb[4].mxu1 }
 0x3be   :  { %v1236_v16 = vadd.f32 %v1748_v10, %v1226_v11  ;;  %v3202_v17 = vpop.f32.mrb[5].mxu1 }
 0x3c0   :  { %vm1237_vm0 = vcmp.gt.f32.partialorder %v1236_v16, 0.0  ;;  %v1238_v19 = vmul.f32 0.01, %v1236_v16 }
 0x3c2   :  { %v1239_v22 = vsel %vm1237_vm0, %v1236_v16, %v1238_v19  ;;  %v1535_v16 = vld [vmem:[%s3410_s2 + $0x230] sm:$0xff] }
 0x3c3   :  { %2091 = vmatmul.mubr.f32.vlgmr.msra.gmra.mrb[6].mxu1 %v1239_v22  ;;  %v2374_v19 = vpack.c.bf16 %v1535_v16, %v1534_v15 }
 0x3c4   :  { %2327 = vmatpush3.bf16.msra.mxu1 %v2326_v20  ;;  %2125 = vmatprep.mubr.msk.f32.mxu1 %vm2416_vm2, %v2414_v0  ;;  %v1537_v20 = vld [vmem:[%s3410_s2 + $0x240] sm:$0xff] }
 0x3c5   :  { %2328 = vmatprep.subr.bf16.mxu1 %v2417_v12  ;;  %v2377_v21 = vpack.c.bf16 %v1537_v20, %v1536_v9 }
 0x3c8   :  { %2330 = vmatpush3.bf16.msra.mxu1 %v2329_v23 }
 0x3c9   :  { %2331 = vmatprep.subr.bf16.mxu1 %v2417_v12 }
 0x3cc   :  { %2333 = vmatpush3.bf16.msra.mxu1 %v2332_v28 }
 0x3cd   :  { %2334 = vmatprep.subr.bf16.mxu1 %v2417_v12 }
 0x3d0   :  { %2336 = vmatpush3.bf16.msra.mxu1 %v2335_v31 }
 0x3d1   :  { %2337 = vmatprep.subr.bf16.mxu1 %v2417_v12 }
 0x3d4   :  { %2339 = vmatpush3.bf16.msra.mxu1 %v2338_v35 }
 0x3d5   :  { %2340 = vmatprep.subr.bf16.mxu1 %v2417_v12 }
 0x3d8   :  { %2342 = vmatpush3.bf16.msra.mxu1 %v2341_v38  ;;  %v1615_v38 = vld [vmem:[%s3410_s2 + $0x2b8] sm:$0xff] }
 0x3d9   :  { %2343 = vmatprep.subr.bf16.mxu1 %v2417_v12  ;;  %v2383_v40 = vpack.c.bf16 %v1616_v39, %v1615_v38 }
 0x3dc   :  { %2345 = vmatpush3.bf16.msra.mxu1 %v2344_v41  ;;  %v1617_v41 = vld [vmem:[%s3410_s2 + $0x2c8] sm:$0xff] }
 0x3dd   :  { %2346 = vmatprep.subr.bf16.mxu1 %v2417_v12  ;;  %v2386_v44 = vpack.c.bf16 %v1618_v42, %v1617_v41 }
 0x3e0   :  { %2348 = vmatpush3.bf16.msra.mxu1 %v2347_v45  ;;  %v1619_v45 = vld [vmem:[%s3410_s2 + $0x2d8] sm:$0xff] }
 0x3e1   :  { %2349 = vmatprep.subr.bf16.mxu1 %v2417_v12 }
 0x496   :  { %v1333_v47 = vpop.f32.mrb[6].mxu1 }
 0x497   :  { %v1334_v49 = vadd.f32 %v1750_v46, %v1333_v47  ;;  %v2092_v50 = vpop.f32.mrb[7].mxu1  ;;  %v1621_v47 = vld [vmem:[%s3410_s2 + $0x2e8] sm:$0xff] }
 0x498   :  { %v2392_v48 = vpack.c.bf16 %v1622_v18, %v1621_v47  ;;  %v1624_v50 = vld [vmem:[%s3410_s2 + $0x300] sm:$0xff] }
 0x499   :  { %vm1337_vm1 = vcmp.gt.f32.partialorder %v1334_v49, 0.0  ;;  %v1338_v63 = vmul.f32 0.01, %v1334_v49 }
 0x49b   :  { %v1339_v53 = vsel %vm1337_vm1, %v1334_v49, %v1338_v63  ;;  %v1623_v49 = vld [vmem:[%s3410_s2 + $0x2f8] sm:$0xff] }
 0x49c   :  { %2126 = vmatmul.mubr.f32.vlgmr.msra.gmra.mrb[8].mxu1 %v1339_v53  ;;  %v2395_v63 = vpack.c.bf16 %v1624_v50, %v1623_v49  ;;  %v1627_v53 = vld [vmem:[%s3410_s2 + $0x318] sm:$0xff] }
 0x49d   :  { %2351 = vmatpush3.bf16.msra.mxu1 %v2350_v51  ;;  %2160 = vmatprep.mubr.msk.f32.mxu1 %vm2416_vm2, %v2414_v0  ;;  %v1625_v51 = vld [vmem:[%s3410_s2 + $0x308] sm:$0xff] }
 0x49e   :  { %2352 = vmatprep.subr.bf16.mxu1 %v2417_v12  ;;  %v2398_v52 = vpack.c.bf16 %v1626_v43, %v1625_v51 }
 0x4a1   :  { %2354 = vmatpush3.bf16.msra.mxu1 %v2353_v54  ;;  %v1628_v54 = vld [vmem:[%s3410_s2 + $0x320] sm:$0xff] }
 0x4a2   :  { %2355 = vmatprep.subr.bf16.mxu1 %v2417_v12  ;;  %v2401_v55 = vpack.c.bf16 %v1628_v54, %v1627_v53 }
 0x4a5   :  { %2357 = vmatpush3.bf16.msra.mxu1 %v2356_v56  ;;  %v1245_v56 = vadd.f32 %v1749_v36, %v3202_v17 }
 0x4a6   :  { %2358 = vmatprep.subr.bf16.mxu1 %v2417_v12 }
 0x4a9   :  { %2360 = vmatpush3.bf16.msra.mxu1 %v2359_v13 }
 0x4aa   :  { %2361 = vmatprep.subr.bf16.mxu1 %v2417_v12 }
 0x4ad   :  { %2363 = vmatpush3.bf16.msra.mxu1 %v2362_v59 }
 0x4ae   :  { %2364 = vmatprep.subr.bf16.mxu1 %v2417_v12 }
 0x4b1   :  { %2366 = vmatpush3.bf16.msra.mxu1 %v2365_v1 }
 0x4b2   :  { %2367 = vmatprep.subr.bf16.mxu1 %v2417_v12 }
 0x4b5   :  { %2369 = vmatpush3.bf16.msra.mxu1 %v2368_v4 }
 0x4b6   :  { %2370 = vmatprep.subr.bf16.mxu1 %v2417_v12 }
 0x4b9   :  { %2372 = vmatpush3.bf16.msra.mxu1 %v2371_v7 }
 0x4ba   :  { %2373 = vmatprep.subr.bf16.mxu1 %v2417_v12 }
 0x56f   :  { %v1427_v10 = vpop.f32.mrb[8].mxu1 }
 0x570   :  { %v1428_v11 = vadd.f32 %v1751_v8, %v1427_v10  ;;  %v2127_v14 = vpop.f32.mrb[9].mxu1 }
 0x572   :  { %2161 = vmatmul.mubr.f32.vlgmr.msra.gmra.mrb[10].mxu1 %v1428_v11 }
 0x573   :  { %2171 = vmatprep.mubr.msk.f32.mxu1 %vm2416_vm2, %v2414_v0  ;;  %2375 = vmatpush3.bf16.msra.mxu1 %v2374_v19 }
 0x574   :  { %2376 = vmatprep.subr.bf16.mxu1 %v2417_v12 }
 0x577   :  { %2378 = vmatpush3.bf16.msra.mxu1 %v2377_v21 }
 0x578   :  { %2379 = vmatprep.subr.bf16.mxu1 %v2417_v12 }
 0x645   :  { %v1518_v22 = vpop.f32.mrb[10].mxu1 }
 0x646   :  { %v1519_v23 = vadd.f32 %v1752_v27, %v1518_v22  ;;  %v2162_v24 = vpop.f32.mrb[11].mxu1 }
 0x648   :  { %v1522_v25 = vmul.f32 0.5, %v1519_v23  ;;  %1704 = vst [vmem:[%s3414_s4] sm:$0xff] %v1519_v23 }
 0x64a   :  { %v1523_v28 = vmul.f32 1.442695, %v1522_v25 }
 0x64c   :  { %2412 = vpow2.f32 %v1523_v28 }
 0x656   :  { %v2413_v30 = vpop.eup %2412 }
 0x657   :  { %v1528_v31 = vmul.f32 %v2413_v30, %v1526_v29 }
 0x659   :  { %1530 = vrot.lane.b32.xlu0 %v1528_v31, %s2420_s21 }
 0x6cb   :  { %v1531_v35 = vpop.permute.xlu0 %1530 }
 0x6cc   :  { %v1533_v26 = vadd.f32 %v1531_v35, %v1519_v23 }
 0x6ce   :  { %2172 = vmatmul.mubr.msk.f32.vlgmr.msra.gmra.mrb[12].mxu1 %vm1538_vm3, %v1533_v26 }
 0x6cf   :  { %2381 = vmatpush3.bf16.msra.mxu1 %v2380_v37  ;;  %2206 = vmatprep.mubr.msk.f32.mxu1 %vm2416_vm2, %v2414_v0  ;;  %v1620_v0 = vld [vmem:[%s3410_s2 + $0x2e0] sm:$0xff] }
 0x6d0   :  { %2382 = vmatprep.subr.bf16.mxu1 %v2417_v12  ;;  %v2389_v46 = vpack.c.bf16 %v1620_v0, %v1619_v45 }
 0x6d3   :  { %2384 = vmatpush3.bf16.msra.mxu1 %v2383_v40 }
 0x6d4   :  { %2385 = vmatprep.subr.bf16.mxu1 %v2417_v12 }
 0x6d7   :  { %2387 = vmatpush3.bf16.msra.mxu1 %v2386_v44 }
 0x6d8   :  { %2388 = vmatprep.subr.bf16.mxu1 %v2417_v12 }
 0x6db   :  { %2390 = vmatpush3.bf16.msra.mxu1 %v2389_v46 }
 0x6dc   :  { %2391 = vmatprep.subr.bf16.mxu1 %v2417_v12 }
 0x6df   :  { %2393 = vmatpush3.bf16.msra.mxu1 %v2392_v48 }
 0x6e0   :  { %2394 = vmatprep.subr.bf16.mxu1 %v2417_v12 }
 0x6e3   :  { %2396 = vmatpush3.bf16.msra.mxu1 %v2395_v63 }
 0x6e4   :  { %2397 = vmatprep.subr.bf16.mxu1 %v2417_v12 }
 0x6e7   :  { %2399 = vmatpush3.bf16.msra.mxu1 %v2398_v52 }
 0x6e8   :  { %2400 = vmatprep.subr.bf16.mxu1 %v2417_v12  ;;  %v1754_v12 = vld [vmem:[%s3410_s2 + $0x4] ss:$0 sm:$0xff] }
 0x6eb   :  { %2402 = vmatpush3.bf16.msra.mxu1 %v2401_v55 }
 0x7a1   :  { %v1608_v32 = vpop.f32.mrb[12].mxu1 }
 0x7a2   :  { %v1612_v57 = vadd.f32 %v1608_v32, %v1245_v56  ;;  %v2173_v13 = vpop.f32.mrb[13].mxu1 }
 0x7a4   :  { %2207 = vmatmul.mubr.f32.vlgmr.msra.gmra.mrb[14].mxu1 %v1612_v57 }
 0x877   :  { %v1700_v58 = vpop.f32.mrb[14].mxu1 }
 0x878   :  { %v1701_v60 = vadd.f32 %v1754_v12, %v1700_v58  ;;  %v2208_v59 = vpop.f32.mrb[15].mxu1 }
 0x87a   :  { %1705 = vst [vmem:[%s3414_s4 + $0x8] sm:$0xff] %v1701_v60 }

</bundles_post_ra>
